<compile_context>
chip_gen: v7x
topology: tpu7x:2x2x1
jax: 0.10.0
libtpu: 0.0.40
codegen_flags: <defaults>
</compile_context>

<pallas_src>
import functools

import jax
import jax.numpy as jnp
from jax.experimental import pallas as pl
from jax.experimental.pallas import tpu as pltpu


def _elu_exact(x):
    """ELU with an accurate negative branch (equivalent to expm1).

    Kahan formulation expm1(x) = (exp(x)-1) * x / log(exp(x)), built only from
    exp / log / where / div so it is guaranteed to lower on Mosaic.
    """
    xn = jnp.maximum(jnp.minimum(x, 0.0), -80.0)   # clamp: exp never underflows
    u = jnp.exp(xn)
    um1 = u - 1.0
    em1 = jnp.where(u == 1.0, xn, um1 * xn / jnp.log(u))
    return jnp.where(x > 0, x, em1)


# --------------------------------------------------------------------------
# Kernel A: projection  Wh = h @ W  + attention pre-products (computed once)
# --------------------------------------------------------------------------
def _project_kernel(h_ref, w_ref, a1_ref, a2_ref,
                    wh_bf16_ref, wh1_ref, wh2_ref):
    wh = jnp.dot(h_ref[...].astype(jnp.bfloat16),
                 w_ref[...].astype(jnp.bfloat16),
                 preferred_element_type=jnp.float32)            # (T, F) f32
    wh_bf16_ref[...] = wh.astype(jnp.bfloat16)                  # for MXU aggregation
    # Attention-vector products as VPU lane reductions (no 1-lane matmuls).
    wh1_ref[...] = jnp.sum(wh * a1_ref[...], axis=-1, keepdims=True)   # (T, 1)
    wh2_ref[...] = jnp.sum(wh * a2_ref[...], axis=-1, keepdims=True)   # (T, 1)


# --------------------------------------------------------------------------
# Kernel B: attention logits + masked softmax + aggregation + ELU
# (one row-tile of the output per grid step)
# --------------------------------------------------------------------------
def _attention_kernel(wh_bf16_ref, wh1_ref, wh2_ref, adj_ref, out_ref,
                      *, alpha, concat):
    # e[i, j] = leakyrelu(wh1[i] + wh2[j])  -- pre-products come from Kernel A.
    e = wh1_ref[...] + wh2_ref[...]                       # (T,1)+(1,N) -> (T,N)
    e = jnp.where(e > 0, e, alpha * e)                    # LeakyReLU

    # Masked row softmax (same -2**31 padding trick as the PyTorch reference;
    # a row with no edges degenerates to a uniform distribution, like torch).
    neg = jnp.float32(-(2 ** 31))
    att = jnp.where(adj_ref[...] > 0, e, neg)             # int8 mask compare
    att = att - jnp.max(att, axis=-1, keepdims=True)
    p = jnp.exp(att)
    att = p * pl.reciprocal(jnp.sum(p, axis=-1, keepdims=True), approx=True)

    # Aggregate: h' = attention @ Wh  (bf16 MXU inputs, f32 accumulation).
    h_prime = jnp.dot(att.astype(jnp.bfloat16), wh_bf16_ref[...],
                      preferred_element_type=jnp.float32)  # (T, F)

    if concat:
        h_prime = _elu_exact(h_prime)

    out_ref[...] = h_prime.astype(out_ref.dtype)


# --------------------------------------------------------------------------
# Generation-aware VMEM budgets and tile selection
# --------------------------------------------------------------------------
def _vmem_capacity_bytes():
    try:
        return int(pltpu.get_tpu_info().vmem_capacity_bytes)
    except Exception:
        return 64 << 20   # conservative fallback (v7x per-TC VMEM)


def _budgets():
    cap = _vmem_capacity_bytes()
    if cap >= (96 << 20):
        # v5e / v6e: 128 MiB per core -> big tiles, generous limit.
        return 56 << 20, 96 << 20
    # v7x: 64 MiB per core -> keep working set <= ~40 MiB, cap limit at 48 MiB.
    return 36 << 20, 48 << 20


def _pick_tile_rows(n, f_out, ws_budget):
    """Largest row tile whose Kernel-B working set fits the per-gen budget."""
    # Per output-row bytes: adj int8 (double-buffered) + ~5 f32 (row, N) passes.
    per_row = 22 * n
    # Constant blocks: Wh bf16 (double-buffered) + wh1/wh2 vectors.
    const = 2 * n * f_out * 2 + 2 * n * 4
    cap_rows = max(32, (ws_budget - const) // per_row)
    for cand in (512, 256, 128, 64, 32):     # multiples of 32 (int8 sublane tile)
        if cand <= cap_rows and n % cand == 0:
            return cand
    return n   # small / ragged N: single row tile


# --------------------------------------------------------------------------
# Wrapper
# --------------------------------------------------------------------------
def gat_layer(h, adj, W, a, *, alpha=0.2, concat=True, tile_rows=None,
              out_dtype=jnp.float32):
    """Pallas GraphAttentionLayer forward.

    h: (N, F_in), adj: (N, N), W: (F_in, F_out), a: (2*F_out, 1)
    """
    N, f_in = h.shape
    f_out = W.shape[1]
    assert adj.shape == (N, N)
    assert a.shape == (2 * f_out, 1)

    h = h.astype(jnp.float32)
    W = W.astype(jnp.float32)
    a = a.astype(jnp.float32)
    # adj is only used as a mask: compute (adj > 0) in full precision in the
    # wrapper and ship an int8 0/1 mask (exact for weighted graphs, 4x fewer
    # HBM bytes than f32 for the dominant O(N^2) stream).
    adj_mask = (adj > 0).astype(jnp.int8)
    # Lane-major attention rows (no (F_out, 1) lane-padded operands).
    a1 = a[:f_out].reshape(1, f_out)
    a2 = a[f_out:].reshape(1, f_out)

    ws_budget, limit_cap = _budgets()
    tile_r = tile_rows or _pick_tile_rows(N, f_out, ws_budget)
    if N % tile_r != 0:
        tile_r = N
    grid_r = N // tile_r
    out_itemsize = jnp.dtype(out_dtype).itemsize

    # ---------------- Kernel A: projection + pre-products ----------------
    wh_bf16, wh1, wh2 = pl.pallas_call(
        _project_kernel,
        out_shape=(jax.ShapeDtypeStruct((N, f_out), jnp.bfloat16),
                   jax.ShapeDtypeStruct((N, 1), jnp.float32),
                   jax.ShapeDtypeStruct((N, 1), jnp.float32)),
        grid_spec=pltpu.PrefetchScalarGridSpec(
            num_scalar_prefetch=0,
            grid=(grid_r,),
            in_specs=[
                pl.BlockSpec((tile_r, f_in), lambda i: (i, 0)),
                pl.BlockSpec((f_in, f_out), lambda i: (0, 0)),
                pl.BlockSpec((1, f_out), lambda i: (0, 0)),
                pl.BlockSpec((1, f_out), lambda i: (0, 0)),
            ],
            out_specs=[
                pl.BlockSpec((tile_r, f_out), lambda i: (i, 0)),
                pl.BlockSpec((tile_r, 1), lambda i: (i, 0)),
                pl.BlockSpec((tile_r, 1), lambda i: (i, 0)),
            ],
        ),
        compiler_params=pltpu.CompilerParams(
            dimension_semantics=("parallel",)),
        cost_estimate=pl.CostEstimate(
            flops=int(2 * N * f_in * f_out + 4 * N * f_out),
            transcendentals=0,
            bytes_accessed=int(N * f_in * 4 + f_in * f_out * 4
                               + N * f_out * 2 + N * 8)),
    )(h, W, a1, a2)

    # (N,1) -> (1,N): row-major layouts are identical, so this reshape is a
    # free metadata change in XLA; keeps Kernel B free of per-tile transposes.
    wh2_row = wh2.reshape(1, N)

    # ---------------- Kernel B: attention + aggregation ----------------
    kernel = functools.partial(_attention_kernel, alpha=float(alpha),
                               concat=bool(concat))

    # VMEM budget: adj int8 tile (double-buffered) + constant Wh bf16 block
    # (double-buffered by the pipeliner even though it is DMA'd only once)
    # + wh1/wh2 + output tile + ~5 f32 (tile_r, N) softmax-chain temporaries.
    vmem_est = (2 * tile_r * N
                + 2 * N * f_out * 2
                + 2 * (tile_r + N) * 4
                + 2 * tile_r * f_out * out_itemsize
                + 5 * tile_r * N * 4)
    vmem_limit = int(min(max(vmem_est + (4 << 20), 32 << 20), limit_cap))

    out = pl.pallas_call(
        kernel,
        out_shape=jax.ShapeDtypeStruct((N, f_out), out_dtype),
        grid_spec=pltpu.PrefetchScalarGridSpec(
            num_scalar_prefetch=0,
            grid=(grid_r,),
            in_specs=[
                pl.BlockSpec((N, f_out), lambda i: (0, 0)),     # Wh bf16 (constant)
                pl.BlockSpec((tile_r, 1), lambda i: (i, 0)),    # wh1 row-tile
                pl.BlockSpec((1, N), lambda i: (0, 0)),         # wh2 row (constant)
                pl.BlockSpec((tile_r, N), lambda i: (i, 0)),    # adj int8 row-tile
            ],
            out_specs=pl.BlockSpec((tile_r, f_out), lambda i: (i, 0)),
        ),
        compiler_params=pltpu.CompilerParams(
            dimension_semantics=("parallel",),
            vmem_limit_bytes=vmem_limit),
        cost_estimate=pl.CostEstimate(
            flops=int(2 * N * N * f_out + 6 * N * N),
            transcendentals=int(N * N),
            bytes_accessed=int(N * N + N * f_out * 2 + N * 8
                               + N * f_out * out_itemsize)),
    )(wh_bf16, wh1, wh2_row, adj_mask)

    return out


# --------------------------------------------------------------------------
# Reference + demo
# --------------------------------------------------------------------------
def _xavier_uniform(key, shape, gain):
    fan_in, fan_out = shape[0], shape[1]
    bound = gain * (6.0 / (fan_in + fan_out)) ** 0.5
    return jax.random.uniform(key, shape, jnp.float32, -bound, bound)


def _reference(h, adj, W, a, alpha, concat):
    f_out = W.shape[1]
    wh = h @ W
    e = wh @ a[:f_out] + (wh @ a[f_out:]).T
    e = jnp.where(e > 0, e, alpha * e)
    att = jnp.where(adj > 0, e, jnp.float32(-(2 ** 31)))
    att = jax.nn.softmax(att, axis=1)
    hp = att @ wh
    return jax.nn.elu(hp) if concat else hp


if __name__ == "__main__":
    # Small but representative shapes: F_OUT=128 keeps the output lane-dense.
    N, F_IN, F_OUT = 512, 64, 128
    ALPHA = 0.2
    CONCAT = True

    key = jax.random.PRNGKey(0)
    k_h, k_adj, k_w, k_a = jax.random.split(key, 4)

    h = jax.random.normal(k_h, (N, F_IN), jnp.float32)
    # Random sparse-ish adjacency with self loops (so every row has an edge).
    adj = (jax.random.uniform(k_adj, (N, N)) < 0.05).astype(jnp.float32)
    adj = jnp.maximum(adj, jnp.eye(N, dtype=jnp.float32))

    W = _xavier_uniform(k_w, (F_IN, F_OUT), gain=1.414)
    a = _xavier_uniform(k_a, (2 * F_OUT, 1), gain=1.414)

    ref = _reference(h, adj, W, a, ALPHA, CONCAT)

    # 1) Generation-aware auto-picked tile size.
    out = gat_layer(h, adj, W, a, alpha=ALPHA, concat=CONCAT)
    out = jax.block_until_ready(out)
    assert out.shape == (N, F_OUT)
    # bf16 MXU inputs (f32 accumulation) + approx reciprocal => bf16-level tol.
    assert jnp.allclose(out, ref, atol=3e-2, rtol=3e-2), "mismatch (auto tile)"

    # 2) Explicit multi-tile grid to exercise the row pipeline / index maps.
    out_tiled = gat_layer(h, adj, W, a, alpha=ALPHA, concat=CONCAT,
                          tile_rows=128)
    out_tiled = jax.block_until_ready(out_tiled)
    assert jnp.allclose(out_tiled, ref, atol=3e-2, rtol=3e-2), \
        "mismatch (tiled grid)"

    print("KERNEL_OK")
</pallas_src>

<mosaic_0001>
module attributes {stable_mosaic.version = 11 : i64} {
  func.func @_project_kernel(%arg0: i32, %arg1: memref<512x64xf32, #tpu.memory_space<vmem>>, %arg2: memref<64x128xf32, #tpu.memory_space<vmem>>, %arg3: memref<1x128xf32, #tpu.memory_space<vmem>>, %arg4: memref<1x128xf32, #tpu.memory_space<vmem>>, %arg5: memref<512x128xbf16, #tpu.memory_space<vmem>>, %arg6: memref<512x1xf32, #tpu.memory_space<vmem>>, %arg7: memref<512x1xf32, #tpu.memory_space<vmem>>) attributes {dimension_semantics = [#tpu.dimension_semantics<parallel>], iteration_bounds = array<i64: 1>, scalar_prefetch = 0 : i64, scratch_operands = 0 : i64, tpu.core_type = #tpu.core_type<tc>, window_params = [{transform_indices = @transform_0, window_bounds = array<i64: 512, 64>}, {pipeline_mode = #tpu.pipeline_mode<synchronous>, transform_indices = @transform_1, window_bounds = array<i64: 64, 128>}, {pipeline_mode = #tpu.pipeline_mode<synchronous>, transform_indices = @transform_2, window_bounds = array<i64: 1, 128>}, {pipeline_mode = #tpu.pipeline_mode<synchronous>, transform_indices = @transform_3, window_bounds = array<i64: 1, 128>}, {transform_indices = @transform_4, window_bounds = array<i64: 512, 128>}, {transform_indices = @transform_5, window_bounds = array<i64: 512, 1>}, {transform_indices = @transform_6, window_bounds = array<i64: 512, 1>}]} {
    %c0 = arith.constant 0 : index
    %c0_0 = arith.constant 0 : index
    %0 = vector.load %arg1[%c0, %c0_0] : memref<512x64xf32, #tpu.memory_space<vmem>>, vector<512x64xf32>
    %1 = arith.truncf %0 : vector<512x64xf32> to vector<512x64xbf16>
    %c0_1 = arith.constant 0 : index
    %c0_2 = arith.constant 0 : index
    %2 = vector.load %arg2[%c0_1, %c0_2] : memref<64x128xf32, #tpu.memory_space<vmem>>, vector<64x128xf32>
    %3 = arith.truncf %2 : vector<64x128xf32> to vector<64x128xbf16>
    %cst = arith.constant dense<0.000000e+00> : vector<512x128xf32>
    %4 = tpu.matmul %1, %3, %cst {dimension_numbers = #tpu.dot_dimension_numbers<[1], [0], [0], [1], [0, 0, 1, 1], [], []>} : vector<512x64xbf16>, vector<64x128xbf16>, vector<512x128xf32> -> vector<512x128xf32>
    %5 = arith.truncf %4 : vector<512x128xf32> to vector<512x128xbf16>
    %c0_3 = arith.constant 0 : index
    %c0_4 = arith.constant 0 : index
    %6 = vector.load %arg5[%c0_3, %c0_4] : memref<512x128xbf16, #tpu.memory_space<vmem>>, vector<512x128xbf16>
    tpu.vector_store %arg5[%c0_3, %c0_4], %5 {strides = array<i32>} : memref<512x128xbf16, #tpu.memory_space<vmem>>, vector<512x128xbf16>,
    %c0_5 = arith.constant 0 : index
    %c0_6 = arith.constant 0 : index
    %7 = vector.load %arg3[%c0_5, %c0_6] : memref<1x128xf32, #tpu.memory_space<vmem>>, vector<1x128xf32>
    %8 = vector.broadcast %7 : vector<1x128xf32> to vector<512x128xf32>
    %9 = arith.mulf %4, %8 : vector<512x128xf32>
    %cst_7 = arith.constant dense<0.000000e+00> : vector<512xf32>
    %10 = vector.multi_reduction <add>, %9, %cst_7 [1] : vector<512x128xf32> to vector<512xf32>
    %11 = vector.shape_cast %10 : vector<512xf32> to vector<512x1xf32>
    %c0_8 = arith.constant 0 : index
    %c0_9 = arith.constant 0 : index
    %12 = vector.load %arg6[%c0_8, %c0_9] : memref<512x1xf32, #tpu.memory_space<vmem>>, vector<512x1xf32>
    tpu.vector_store %arg6[%c0_8, %c0_9], %11 {strides = array<i32>} : memref<512x1xf32, #tpu.memory_space<vmem>>, vector<512x1xf32>,
    %c0_10 = arith.constant 0 : index
    %c0_11 = arith.constant 0 : index
    %13 = vector.load %arg4[%c0_10, %c0_11] : memref<1x128xf32, #tpu.memory_space<vmem>>, vector<1x128xf32>
    %14 = vector.broadcast %13 : vector<1x128xf32> to vector<512x128xf32>
    %15 = arith.mulf %4, %14 : vector<512x128xf32>
    %cst_12 = arith.constant dense<0.000000e+00> : vector<512xf32>
    %16 = vector.multi_reduction <add>, %15, %cst_12 [1] : vector<512x128xf32> to vector<512xf32>
    %17 = vector.shape_cast %16 : vector<512xf32> to vector<512x1xf32>
    %c0_13 = arith.constant 0 : index
    %c0_14 = arith.constant 0 : index
    %18 = vector.load %arg7[%c0_13, %c0_14] : memref<512x1xf32, #tpu.memory_space<vmem>>, vector<512x1xf32>
    tpu.vector_store %arg7[%c0_13, %c0_14], %17 {strides = array<i32>} : memref<512x1xf32, #tpu.memory_space<vmem>>, vector<512x1xf32>,
    return
  }
  func.func @transform_0(%arg0: i32) -> (i32, i32) {
    %c0_i32 = arith.constant 0 : i32
    %c0_i32_0 = arith.constant 0 : i32
    return %arg0, %c0_i32 : i32, i32
  }
  func.func @transform_1(%arg0: i32) -> (i32, i32) {
    %c0_i32 = arith.constant 0 : i32
    %c0_i32_0 = arith.constant 0 : i32
    %c0_i32_1 = arith.constant 0 : i32
    return %c0_i32, %c0_i32_0 : i32, i32
  }
  func.func @transform_2(%arg0: i32) -> (i32, i32) {
    %c0_i32 = arith.constant 0 : i32
    %c0_i32_0 = arith.constant 0 : i32
    %c0_i32_1 = arith.constant 0 : i32
    return %c0_i32, %c0_i32_0 : i32, i32
  }
  func.func @transform_3(%arg0: i32) -> (i32, i32) {
    %c0_i32 = arith.constant 0 : i32
    %c0_i32_0 = arith.constant 0 : i32
    %c0_i32_1 = arith.constant 0 : i32
    return %c0_i32, %c0_i32_0 : i32, i32
  }
  func.func @transform_4(%arg0: i32) -> (i32, i32) {
    %c0_i32 = arith.constant 0 : i32
    %c0_i32_0 = arith.constant 0 : i32
    return %arg0, %c0_i32 : i32, i32
  }
  func.func @transform_5(%arg0: i32) -> (i32, i32) {
    %c0_i32 = arith.constant 0 : i32
    %c0_i32_0 = arith.constant 0 : i32
    return %arg0, %c0_i32 : i32, i32
  }
  func.func @transform_6(%arg0: i32) -> (i32, i32) {
    %c0_i32 = arith.constant 0 : i32
    %c0_i32_0 = arith.constant 0 : i32
    return %arg0, %c0_i32 : i32, i32
  }
}

</mosaic_0001>

<bundles_post_ra>
// kernel: tpu_custom_call.1
= control target key start
LH: loop header
LB: loop body
LE: loop exit
PB: predicated region body
PF: predicated region fallthrough
CT: control target
= control target key end

     0   :  { %vm130_vm0 = vcmask 523264   ;;  %s3131_s0 = inlined_call_operand.vmem [shape: f32[512,64], index: 0, kind: input, shape index: {}]   ;;  %s3132_s1 = inlined_call_operand.vmem [shape: f32[64,128], index: 1, kind: input, shape index: {}]   ;;  %s3133_s2 = inlined_call_operand.vmem [shape: f32[1,128], index: 2, kind: input, shape index: {}]   ;;  %s3134_s3 = inlined_call_operand.vmem [shape: f32[1,128], index: 3, kind: input, shape index: {}]   ;;  %s3135_s4 = inlined_call_operand.hbm [shape: bf16[512,128], index: 4, kind: output, shape index: {0}]   ;;  %s3136_s5 = inlined_call_operand.vmem [shape: f32[512,1], index: 5, kind: output, shape index: {1}]   ;;  %s3137_s6 = inlined_call_operand.vmem [shape: f32[512,1], index: 6, kind: output, shape index: {2}]  }
   0x1   :  { %v118_v0 = vld [vmem:[%s3132_s1] sm:$0xff]  ;;  %v119_v1 = vld [vmem:[%s3132_s1 + $0x8] sm:$0xff]  ;;  %v120_v2 = vld [vmem:[%s3132_s1 + $0x10] sm:$0xff] }
   0x2   :  { %v126_v3 = vpack.c.bf16 %v119_v1, %v118_v0  ;;  %v121_v4 = vld [vmem:[%s3132_s1 + $0x18] sm:$0xff]  ;;  %v122_v6 = vld [vmem:[%s3132_s1 + $0x20] sm:$0xff]  ;;  %v123_v7 = vld [vmem:[%s3132_s1 + $0x28] sm:$0xff] }
   0x3   :  { %v127_v5 = vpack.c.bf16 %v121_v4, %v120_v2  ;;  %v22_v8 = vld [vmem:[%s3131_s0] sm:$0xff]  ;;  %v23_v9 = vld [vmem:[%s3131_s0 + $0x8] sm:$0xff]  ;;  %v128_v14 = vpack.c.bf16 %v123_v7, %v122_v6  ;;  %v124_v15 = vld [vmem:[%s3132_s1 + $0x30] sm:$0xff] }
   0x4   :  { %1776 = vmatprep.subr.bf16.mxu0 %v126_v3  ;;  %1848 = vmatprep.subr.bf16.mxu1 %v126_v3  ;;  %v54_v10 = vld [vmem:[%s3131_s0 + $0x100] sm:$0xff]  ;;  %v55_v11 = vld [vmem:[%s3131_s0 + $0x108] sm:$0xff]  ;;  %v86_v12 = vpack.c.bf16 %v23_v9, %v22_v8  ;;  %v125_v16 = vld [vmem:[%s3132_s1 + $0x38] sm:$0xff] }
   0x5   :  { %1777 = vmatpush3.bf16.msra.mxu0 %v126_v3  ;;  %1852 = vmatpush3.bf16.msra.mxu1 %v126_v3  ;;  %v102_v13 = vpack.c.bf16 %v55_v11, %v54_v10  ;;  %v129_v17 = vpack.c.bf16 %v125_v16, %v124_v15  ;;  %v24_v18 = vld [vmem:[%s3131_s0 + $0x10] sm:$0xff]  ;;  %v25_v19 = vld [vmem:[%s3131_s0 + $0x18] sm:$0xff]  ;;  %v26_v22 = vld [vmem:[%s3131_s0 + $0x20] sm:$0xff] }
   0x6   :  { %1778 = vmatprep.subr.bf16.mxu0 %v127_v5  ;;  %1849 = vmatprep.subr.bf16.mxu1 %v127_v5  ;;  %v56_v20 = vld [vmem:[%s3131_s0 + $0x110] sm:$0xff]  ;;  %v57_v21 = vld [vmem:[%s3131_s0 + $0x118] sm:$0xff]  ;;  %v27_v23 = vld [vmem:[%s3131_s0 + $0x28] sm:$0xff]  ;;  %v87_v26 = vpack.c.bf16 %v25_v19, %v24_v18 }
   0x7   :  { %1784 = vmatprep.mubr.msk.bf16.mxu0 %vm130_vm0, %v86_v12  ;;  %1816 = vmatprep.mubr.msk.bf16.mxu1 %vm130_vm0, %v102_v13  ;;  %v58_v24 = vld [vmem:[%s3131_s0 + $0x120] sm:$0xff]  ;;  %v59_v25 = vld [vmem:[%s3131_s0 + $0x128] sm:$0xff]  ;;  %v103_v27 = vpack.c.bf16 %v57_v21, %v56_v20  ;;  %v88_v28 = vpack.c.bf16 %v27_v23, %v26_v22  ;;  %v28_v30 = vld [vmem:[%s3131_s0 + $0x30] sm:$0xff] }
   0x8   :  { %v104_v29 = vpack.c.bf16 %v59_v25, %v58_v24  ;;  %v29_v31 = vld [vmem:[%s3131_s0 + $0x38] sm:$0xff]  ;;  %v60_v32 = vld [vmem:[%s3131_s0 + $0x130] sm:$0xff]  ;;  %v30_v34 = vld [vmem:[%s3131_s0 + $0x40] sm:$0xff] }
   0x9   :  { %1779 = vmatpush3.bf16.msra.mxu0 %v127_v5  ;;  %1853 = vmatpush3.bf16.msra.mxu1 %v127_v5  ;;  %v61_v33 = vld [vmem:[%s3131_s0 + $0x138] sm:$0xff]  ;;  %v31_v35 = vld [vmem:[%s3131_s0 + $0x48] sm:$0xff]  ;;  %v62_v36 = vld [vmem:[%s3131_s0 + $0x140] sm:$0xff] }
   0xa   :  { %1780 = vmatprep.subr.bf16.mxu0 %v128_v14  ;;  %1850 = vmatprep.subr.bf16.mxu1 %v128_v14  ;;  %v63_v37 = vld [vmem:[%s3131_s0 + $0x148] sm:$0xff] }
   0xd   :  { %1781 = vmatpush3.bf16.msra.mxu0 %v128_v14  ;;  %1854 = vmatpush3.bf16.msra.mxu1 %v128_v14 }
   0xe   :  { %1782 = vmatprep.subr.bf16.mxu0 %v129_v17  ;;  %1851 = vmatprep.subr.bf16.mxu1 %v129_v17 }
  0x11   :  { %1783 = vmatpush3.bf16.msra.mxu0 %v129_v17  ;;  %1855 = vmatpush3.bf16.msra.mxu1 %v129_v17 }
  0x14   :  { %1785 = vmatmul.mubr.msk.bf16.vlgmr.msra.gmra.mrb[0].mxu0 %vm130_vm0, %v87_v26  ;;  %1817 = vmatmul.mubr.msk.bf16.vlgmr.msra.gmra.mrb[0].mxu1 %vm130_vm0, %v103_v27 }
  0x15   :  { %1788 = vmatprep.mubr.msk.bf16.mxu0 %vm130_vm0, %v88_v28  ;;  %1820 = vmatprep.mubr.msk.bf16.mxu1 %vm130_vm0, %v104_v29 }
  0x16   :  { %12 = vsyncpa [#allocation3], 0  ;;  %v89_v38 = vpack.c.bf16 %v29_v31, %v28_v30  ;;  %v105_v39 = vpack.c.bf16 %v61_v33, %v60_v32  ;;  %v90_v40 = vpack.c.bf16 %v31_v35, %v30_v34  ;;  %v106_v41 = vpack.c.bf16 %v63_v37, %v62_v36  ;;  %v32_v42 = vld [vmem:[%s3131_s0 + $0x50] sm:$0xff]  ;;  %v33_v43 = vld [vmem:[%s3131_s0 + $0x58] sm:$0xff]  ;;  %s1883_s8 = smov [#allocation2]  }
  0x17   :  { %v64_v44 = vld [vmem:[%s3131_s0 + $0x150] sm:$0xff]  ;;  %v65_v45 = vld [vmem:[%s3131_s0 + $0x158] sm:$0xff]  ;;  %v34_v46 = vld [vmem:[%s3131_s0 + $0x60] sm:$0xff]  ;;  %v91_v50 = vpack.c.bf16 %v33_v43, %v32_v42  ;;  %vm1035_vm1 = vcmask 7168   ;;  %s1368_s9 = sshll.u32 %s1883_s8, 4  ;;  %s1369_s9 = int_to_ptr.vmem [resolvable:$true] %s1368_s9 }
  0x18   :  { %v35_v47 = vld [vmem:[%s3131_s0 + $0x68] sm:$0xff]  ;;  %v66_v48 = vld [vmem:[%s3131_s0 + $0x160] sm:$0xff]  ;;  %v107_v51 = vpack.c.bf16 %v65_v45, %v64_v44  ;;  %v36_v54 = vld [vmem:[%s3131_s0 + $0x70] sm:$0xff]  ;;  %s1859_s10 = scalar_lea.vmem %s1369_s9, 4096  ;;  %p1864_p1 = scmp.lt.s32.totalorder %s1369_s9, %s1369_s9 }
  0x19   :  { %v67_v49 = vld [vmem:[%s3131_s0 + $0x168] sm:$0xff]  ;;  %v92_v52 = vpack.c.bf16 %v35_v47, %v34_v46  ;;  %v37_v55 = vld [vmem:[%s3131_s0 + $0x78] sm:$0xff]  ;;  %v68_v56 = vld [vmem:[%s3131_s0 + $0x170] sm:$0xff]  ;;  %p1860_p0 = scmp.ne.s32.totalorder %s1369_s9, %s1859_s10  ;;  %p1865_p2 = scmp.lt.s32.totalorder %s1859_s10, %s1859_s10 }
  0x1a   :  { %v108_v53 = vpack.c.bf16 %v67_v49, %v66_v48  ;;  %v69_v57 = vld [vmem:[%s3131_s0 + $0x178] sm:$0xff]  ;;  %v38_v58 = vld [vmem:[%s3131_s0 + $0x80] sm:$0xff]  ;;  %v39_v59 = vld [vmem:[%s3131_s0 + $0x88] sm:$0xff]  ;;  %v93_v62 = vpack.c.bf16 %v37_v55, %v36_v54 }
  0x1b   :  { %v70_v60 = vld [vmem:[%s3131_s0 + $0x180] sm:$0xff]  ;;  %v71_v61 = vld [vmem:[%s3131_s0 + $0x188] sm:$0xff]  ;;  %v109_v63 = vpack.c.bf16 %v69_v57, %v68_v56  ;;  %v94_v0 = vpack.c.bf16 %v39_v59, %v38_v58  ;;  %v40_v2 = vld [vmem:[%s3131_s0 + $0x90] sm:$0xff]  ;;  %p1866_p3 = por %p1865_p2, %p1864_p1 }
  0x1c   :  { %1789 = vmatmul.mubr.msk.bf16.gmra.mrb[4].mxu0 %vm130_vm0, %v89_v38  ;;  %1821 = vmatmul.mubr.msk.bf16.gmra.mrb[4].mxu1 %vm130_vm0, %v105_v39  ;;  %v110_v1 = vpack.c.bf16 %v71_v61, %v70_v60  ;;  %v41_v3 = vld [vmem:[%s3131_s0 + $0x98] sm:$0xff]  ;;  %v72_v4 = vld [vmem:[%s3131_s0 + $0x190] sm:$0xff]  ;;  %v42_v6 = vld [vmem:[%s3131_s0 + $0xa0] sm:$0xff] }
  0x1d   :  { %1792 = vmatprep.mubr.msk.bf16.mxu0 %vm130_vm0, %v90_v40  ;;  %1824 = vmatprep.mubr.msk.bf16.mxu1 %vm130_vm0, %v106_v41  ;;  %v73_v5 = vld [vmem:[%s3131_s0 + $0x198] sm:$0xff]  ;;  %v43_v7 = vld [vmem:[%s3131_s0 + $0xa8] sm:$0xff]  ;;  %v74_v8 = vld [vmem:[%s3131_s0 + $0x1a0] sm:$0xff]  ;;  %v95_v10 = vpack.c.bf16 %v41_v3, %v40_v2  ;;  %p1867_p4 = pnand %p1866_p3, %p1860_p0 }
  0x1e   :  { %v75_v9 = vld [vmem:[%s3131_s0 + $0x1a8] sm:$0xff]  ;;  %v111_v11 = vpack.c.bf16 %v73_v5, %v72_v4  ;;  %v96_v12 = vpack.c.bf16 %v43_v7, %v42_v6  ;;  %v44_v14 = vld [vmem:[%s3131_s0 + $0xb0] sm:$0xff]  ;;  %v45_v15 = vld [vmem:[%s3131_s0 + $0xb8] sm:$0xff] }
  0x1f   :  { %v112_v13 = vpack.c.bf16 %v75_v9, %v74_v8  ;;  %v76_v16 = vld [vmem:[%s3131_s0 + $0x1b0] sm:$0xff]  ;;  %v77_v17 = vld [vmem:[%s3131_s0 + $0x1b8] sm:$0xff]  ;;  %v46_v18 = vld [vmem:[%s3131_s0 + $0xc0] sm:$0xff]  ;;  %v97_v22 = vpack.c.bf16 %v45_v15, %v44_v14 }
  0x20   :  { %v47_v19 = vld [vmem:[%s3131_s0 + $0xc8] sm:$0xff]  ;;  %v78_v20 = vld [vmem:[%s3131_s0 + $0x1c0] sm:$0xff]  ;;  %v113_v23 = vpack.c.bf16 %v77_v17, %v76_v16  ;;  %v48_v26 = vld [vmem:[%s3131_s0 + $0xd0] sm:$0xff] }
  0x21   :  { %v79_v21 = vld [vmem:[%s3131_s0 + $0x1c8] sm:$0xff]  ;;  %v98_v24 = vpack.c.bf16 %v47_v19, %v46_v18  ;;  %v49_v27 = vld [vmem:[%s3131_s0 + $0xd8] sm:$0xff]  ;;  %v80_v28 = vld [vmem:[%s3131_s0 + $0x1d0] sm:$0xff] }
  0x22   :  { %v114_v25 = vpack.c.bf16 %v79_v21, %v78_v20  ;;  %v81_v29 = vld [vmem:[%s3131_s0 + $0x1d8] sm:$0xff]  ;;  %v99_v30 = vpack.c.bf16 %v49_v27, %v48_v26  ;;  %v50_v32 = vld [vmem:[%s3131_s0 + $0xe0] sm:$0xff]  ;;  %v51_v33 = vld [vmem:[%s3131_s0 + $0xe8] sm:$0xff] }
  0x23   :  { %v115_v31 = vpack.c.bf16 %v81_v29, %v80_v28  ;;  %v100_v34 = vpack.c.bf16 %v51_v33, %v50_v32  ;;  %v52_v35 = vld [vmem:[%s3131_s0 + $0xf0] sm:$0xff]  ;;  %v53_v36 = vld [vmem:[%s3131_s0 + $0xf8] sm:$0xff]  ;;  %v82_v38 = vld [vmem:[%s3131_s0 + $0x1e0] sm:$0xff] }
  0x24   :  { %1793 = vmatmul.mubr.msk.bf16.gmra.mrb[8].mxu0 %vm130_vm0, %v91_v50  ;;  %1825 = vmatmul.mubr.msk.bf16.gmra.mrb[8].mxu1 %vm130_vm0, %v107_v51  ;;  %v101_v37 = vpack.c.bf16 %v53_v36, %v52_v35  ;;  %v83_v39 = vld [vmem:[%s3131_s0 + $0x1e8] sm:$0xff]  ;;  %v84_v41 = vld [vmem:[%s3131_s0 + $0x1f0] sm:$0xff]  ;;  %v85_v42 = vld [vmem:[%s3131_s0 + $0x1f8] sm:$0xff] }
  0x25   :  { %1796 = vmatprep.mubr.msk.bf16.mxu0 %vm130_vm0, %v92_v52  ;;  %1828 = vmatprep.mubr.msk.bf16.mxu1 %vm130_vm0, %v108_v53  ;;  %v116_v40 = vpack.c.bf16 %v83_v39, %v82_v38  ;;  %v117_v43 = vpack.c.bf16 %v85_v42, %v84_v41  ;;  %v2172_v44 = vld [vmem:[%s3133_s2] ss:$0 sm:$0xff] }
  0x26   :  { %v2183_v53 = vld [vmem:[%s3134_s3] ss:$0 sm:$0xff] }
  0x2c   :  { %1797 = vmatmul.mubr.msk.bf16.gmra.mrb[12].mxu0 %vm130_vm0, %v93_v62  ;;  %1829 = vmatmul.mubr.msk.bf16.gmra.mrb[12].mxu1 %vm130_vm0, %v109_v63 }
  0x2d   :  { %1800 = vmatprep.mubr.msk.bf16.mxu0 %vm130_vm0, %v94_v0  ;;  %1832 = vmatprep.mubr.msk.bf16.mxu1 %vm130_vm0, %v110_v1 }
  0x34   :  { %1801 = vmatmul.mubr.msk.bf16.gmra.mrb[16].mxu0 %vm130_vm0, %v95_v10  ;;  %1833 = vmatmul.mubr.msk.bf16.gmra.mrb[16].mxu1 %vm130_vm0, %v111_v11 }
  0x35   :  { %1804 = vmatprep.mubr.msk.bf16.mxu0 %vm130_vm0, %v96_v12  ;;  %1836 = vmatprep.mubr.msk.bf16.mxu1 %vm130_vm0, %v112_v13 }
  0x3c   :  { %1805 = vmatmul.mubr.msk.bf16.gmra.mrb[20].mxu0 %vm130_vm0, %v97_v22  ;;  %1837 = vmatmul.mubr.msk.bf16.gmra.mrb[20].mxu1 %vm130_vm0, %v113_v23 }
  0x3d   :  { %1808 = vmatprep.mubr.msk.bf16.mxu0 %vm130_vm0, %v98_v24  ;;  %1840 = vmatprep.mubr.msk.bf16.mxu1 %vm130_vm0, %v114_v25 }
  0x44   :  { %1809 = vmatmul.mubr.msk.bf16.gmra.mrb[24].mxu0 %vm130_vm0, %v99_v30  ;;  %1841 = vmatmul.mubr.msk.bf16.gmra.mrb[24].mxu1 %vm130_vm0, %v115_v31 }
  0x45   :  { %1812 = vmatprep.mubr.msk.bf16.mxu0 %vm130_vm0, %v100_v34  ;;  %1844 = vmatprep.mubr.msk.bf16.mxu1 %vm130_vm0, %v116_v40 }
  0x4c   :  { %1813 = vmatmul.mubr.msk.bf16.gmra.mrb[28].mxu0 %vm130_vm0, %v101_v37  ;;  %1845 = vmatmul.mubr.msk.bf16.gmra.mrb[28].mxu1 %vm130_vm0, %v117_v43 }
  0xe7   :  { %v1786_v45 = vpop.f32.mrb[0].mxu0  ;;  %v1818_v46 = vpop.f32.mrb[0].mxu1 }
  0xe8   :  { %v2174_v47 = vpop.f32.mrb[1].mxu0  ;;  %v2176_v48 = vpop.f32.mrb[1].mxu1  ;;  %v877_v49 = vmul.f32 %v1818_v46, %v2172_v44  ;;  %v845_v50 = vmul.f32 %v1786_v45, %v2172_v44  ;;  %v1109_v60 = vmul.f32 %v1786_v45, %v2183_v53  ;;  %v1141_v0 = vmul.f32 %v1818_v46, %v2183_v53 }
  0xe9   :  { %v1787_v51 = vpop.f32.mrb[2].mxu0  ;;  %v1819_v52 = vpop.f32.mrb[2].mxu1  ;;  %v843_v12 = vmul.f32 %v2172_v44, %v2174_v47  ;;  %v875_v16 = vmul.f32 %v2172_v44, %v2176_v48  ;;  %v1107_v28 = vmul.f32 %v2183_v53, %v2174_v47  ;;  %v1139_v32 = vmul.f32 %v2183_v53, %v2176_v48 }
  0xea   :  { %v1557_v54 = vpack.c.bf16 %v1787_v51, %v1786_v45  ;;  %v1637_v55 = vpack.c.bf16 %v1819_v52, %v1818_v46  ;;  %975 = vadd.xlane.f32.xlu0 %v877_v49  ;;  %v2185_v56 = vpop.f32.mrb[3].mxu1  ;;  %911 = vadd.xlane.f32.xlu1 %v845_v50  ;;  %v2187_v57 = vpop.f32.mrb[3].mxu0  ;;  %v846_v61 = vmul.f32 %v1787_v51, %v2172_v44 }
  0xeb   :  { %v1632_v58 = vpack.c.bf16 %v2185_v56, %v2176_v48  ;;  %v1552_v59 = vpack.c.bf16 %v2187_v57, %v2174_v47  ;;  %v878_v1 = vmul.f32 %v1819_v52, %v2172_v44  ;;  %v1110_v13 = vmul.f32 %v1787_v51, %v2183_v53 }
  0xec   :  { %1709 = vst [vmem:[#allocation2 + $0x8] sm:$0xff] %v1557_v54   ;;  %1725 = vst [vmem:[#allocation2 + $0x88] sm:$0xff] %v1637_v55   ;;  %v1142_v17 = vmul.f32 %v1819_v52, %v2183_v53  ;;  %v876_v29 = vmul.f32 %v2172_v44, %v2185_v56  ;;  %v1108_v33 = vmul.f32 %v2183_v53, %v2187_v57 }
  0xed   :  { %1724 = vst [vmem:[#allocation2 + $0x80] sm:$0xff] %v1632_v58   ;;  %1553 = vst [vmem:[#allocation2] sm:$0xff] %v1552_v59   ;;  %v1140_v45 = vmul.f32 %v2183_v53, %v2185_v56  ;;  %v844_v46 = vmul.f32 %v2172_v44, %v2187_v57 }
  0xee   :  { %1175 = vadd.xlane.f32.xlu0 %v1109_v60  ;;  %913 = vadd.xlane.f32.xlu1 %v846_v61 }
  0xef   :  { %v2195_v62 = vpop.f32.mrb[4].mxu0  ;;  %v2197_v63 = vpop.f32.mrb[4].mxu1 }
  0xf0   :  { %v2201_v2 = vpop.f32.mrb[5].mxu0  ;;  %v2203_v3 = vpop.f32.mrb[5].mxu1  ;;  %v849_v49 = vmul.f32 %v2195_v62, %v2172_v44 }
  0xf1   :  { %v2205_v4 = vpop.f32.mrb[6].mxu0  ;;  %v2207_v5 = vpop.f32.mrb[6].mxu1 }
  0xf2   :  { %1239 = vadd.xlane.f32.xlu0 %v1141_v0  ;;  %977 = vadd.xlane.f32.xlu1 %v878_v1  ;;  %v1567_v6 = vpack.c.bf16 %v2205_v4, %v2195_v62  ;;  %v2211_v7 = vpop.f32.mrb[7].mxu0  ;;  %v1647_v8 = vpack.c.bf16 %v2207_v5, %v2197_v63  ;;  %v2215_v9 = vpop.f32.mrb[7].mxu1  ;;  %v850_v50 = vmul.f32 %v2205_v4, %v2172_v44 }
  0xf3   :  { %v1562_v10 = vpack.c.bf16 %v2211_v7, %v2201_v2  ;;  %v1642_v11 = vpack.c.bf16 %v2215_v9, %v2203_v3  ;;  %v881_v0 = vmul.f32 %v2197_v63, %v2172_v44  ;;  %v882_v1 = vmul.f32 %v2207_v5, %v2172_v44 }
  0xf4   :  { %1711 = vst [vmem:[#allocation2 + $0x18] sm:$0xff] %v1567_v6   ;;  %1727 = vst [vmem:[#allocation2 + $0x98] sm:$0xff] %v1647_v8  }
  0xf5   :  { %1710 = vst [vmem:[#allocation2 + $0x10] sm:$0xff] %v1562_v10   ;;  %1726 = vst [vmem:[#allocation2 + $0x90] sm:$0xff] %v1642_v11   ;;  %v1113_v10 = vmul.f32 %v2195_v62, %v2183_v53  ;;  %v1114_v11 = vmul.f32 %v2205_v4, %v2183_v53 }
  0xf6   :  { %907 = vadd.xlane.f32.xlu0 %v843_v12  ;;  %1177 = vadd.xlane.f32.xlu1 %v1110_v13 }
  0xf7   :  { %v2224_v14 = vpop.f32.mrb[8].mxu0  ;;  %v2226_v15 = vpop.f32.mrb[8].mxu1 }
  0xf8   :  { %v2231_v18 = vpop.f32.mrb[9].mxu0  ;;  %v2233_v19 = vpop.f32.mrb[9].mxu1 }
  0xf9   :  { %v2235_v20 = vpop.f32.mrb[10].mxu0  ;;  %v2237_v21 = vpop.f32.mrb[10].mxu1 }
  0xfa   :  { %971 = vadd.xlane.f32.xlu0 %v875_v16  ;;  %1241 = vadd.xlane.f32.xlu1 %v1142_v17  ;;  %v1577_v22 = vpack.c.bf16 %v2235_v20, %v2224_v14  ;;  %v2241_v23 = vpop.f32.mrb[11].mxu0  ;;  %v1657_v24 = vpack.c.bf16 %v2237_v21, %v2226_v15  ;;  %v2245_v25 = vpop.f32.mrb[11].mxu1 }
  0xfb   :  { %v1572_v26 = vpack.c.bf16 %v2241_v23, %v2231_v18  ;;  %v1652_v27 = vpack.c.bf16 %v2245_v25, %v2233_v19 }
  0xfc   :  { %1713 = vst [vmem:[#allocation2 + $0x28] sm:$0xff] %v1577_v22   ;;  %1729 = vst [vmem:[#allocation2 + $0xa8] sm:$0xff] %v1657_v24  }
  0xfd   :  { %1712 = vst [vmem:[#allocation2 + $0x20] sm:$0xff] %v1572_v26   ;;  %1728 = vst [vmem:[#allocation2 + $0xa0] sm:$0xff] %v1652_v27  }
  0xfe   :  { %1171 = vadd.xlane.f32.xlu0 %v1107_v28  ;;  %973 = vadd.xlane.f32.xlu1 %v876_v29  ;;  %v1145_v28 = vmul.f32 %v2197_v63, %v2183_v53  ;;  %v1146_v29 = vmul.f32 %v2207_v5, %v2183_v53  ;;  %v879_v63 = vmul.f32 %v2172_v44, %v2203_v3 }
  0xff   :  { %v2255_v30 = vpop.f32.mrb[12].mxu0  ;;  %v2257_v31 = vpop.f32.mrb[12].mxu1  ;;  %v880_v5 = vmul.f32 %v2172_v44, %v2215_v9 }
 0x100   :  { %v2263_v34 = vpop.f32.mrb[13].mxu0  ;;  %v2265_v35 = vpop.f32.mrb[13].mxu1 }
 0x101   :  { %v2267_v36 = vpop.f32.mrb[14].mxu0  ;;  %v2269_v37 = vpop.f32.mrb[14].mxu1 }
 0x102   :  { %1235 = vadd.xlane.f32.xlu0 %v1139_v32  ;;  %1173 = vadd.xlane.f32.xlu1 %v1108_v33  ;;  %v1587_v38 = vpack.c.bf16 %v2267_v36, %v2255_v30  ;;  %v2273_v39 = vpop.f32.mrb[15].mxu0  ;;  %v1667_v40 = vpack.c.bf16 %v2269_v37, %v2257_v31  ;;  %v2277_v41 = vpop.f32.mrb[15].mxu1  ;;  %v847_v32 = vmul.f32 %v2172_v44, %v2201_v2 }
 0x103   :  { %v1582_v42 = vpack.c.bf16 %v2273_v39, %v2263_v34  ;;  %v1662_v43 = vpack.c.bf16 %v2277_v41, %v2265_v35  ;;  %v848_v33 = vmul.f32 %v2172_v44, %v2211_v7 }
 0x104   :  { %1715 = vst [vmem:[#allocation2 + $0x38] sm:$0xff] %v1587_v38   ;;  %1731 = vst [vmem:[#allocation2 + $0xb8] sm:$0xff] %v1667_v40   ;;  %v1111_v38 = vmul.f32 %v2183_v53, %v2201_v2  ;;  %v1112_v40 = vmul.f32 %v2183_v53, %v2211_v7 }
 0x105   :  { %1714 = vst [vmem:[#allocation2 + $0x30] sm:$0xff] %v1582_v42   ;;  %1730 = vst [vmem:[#allocation2 + $0xb0] sm:$0xff] %v1662_v43   ;;  %v1143_v43 = vmul.f32 %v2183_v53, %v2203_v3 }
 0x106   :  { %1237 = vadd.xlane.f32.xlu1 %v1140_v45  ;;  %909 = vadd.xlane.f32.xlu0 %v844_v46  ;;  %v1144_v45 = vmul.f32 %v2183_v53, %v2215_v9  ;;  %v853_v9 = vmul.f32 %v2224_v14, %v2172_v44 }
 0x107   :  { %v2287_v47 = vpop.f32.mrb[16].mxu0  ;;  %v2289_v48 = vpop.f32.mrb[16].mxu1 }
 0x108   :  { %v2295_v51 = vpop.f32.mrb[17].mxu0  ;;  %v2297_v52 = vpop.f32.mrb[17].mxu1 }
 0x109   :  { %v2299_v54 = vpop.f32.mrb[18].mxu0  ;;  %v2301_v55 = vpop.f32.mrb[18].mxu1 }
 0x10a   :  { %919 = vadd.xlane.f32.xlu0 %v849_v49  ;;  %921 = vadd.xlane.f32.xlu1 %v850_v50  ;;  %v1597_v56 = vpack.c.bf16 %v2299_v54, %v2287_v47  ;;  %v2305_v57 = vpop.f32.mrb[19].mxu0  ;;  %v1677_v58 = vpack.c.bf16 %v2301_v55, %v2289_v48  ;;  %v2309_v59 = vpop.f32.mrb[19].mxu1 }
 0x10b   :  { %v1592_v60 = vpack.c.bf16 %v2305_v57, %v2295_v51  ;;  %v1672_v61 = vpack.c.bf16 %v2309_v59, %v2297_v52 }
 0x10c   :  { %1717 = vst [vmem:[#allocation2 + $0x48] sm:$0xff] %v1597_v56   ;;  %1733 = vst [vmem:[#allocation2 + $0xc8] sm:$0xff] %v1677_v58   ;;  %v854_v58 = vmul.f32 %v2235_v20, %v2172_v44 }
 0x10d   :  { %1716 = vst [vmem:[#allocation2 + $0x40] sm:$0xff] %v1592_v60   ;;  %1732 = vst [vmem:[#allocation2 + $0xc0] sm:$0xff] %v1672_v61  }
 0x10e   :  { %983 = vadd.xlane.f32.xlu0 %v881_v0  ;;  %985 = vadd.xlane.f32.xlu1 %v882_v1 }
 0x10f   :  { %v2319_v6 = vpop.f32.mrb[20].mxu0  ;;  %v2321_v8 = vpop.f32.mrb[20].mxu1 }
 0x110   :  { %v2327_v12 = vpop.f32.mrb[21].mxu0  ;;  %v2329_v13 = vpop.f32.mrb[21].mxu1 }
 0x111   :  { %v2331_v16 = vpop.f32.mrb[22].mxu0  ;;  %v2333_v17 = vpop.f32.mrb[22].mxu1 }
 0x112   :  { %1183 = vadd.xlane.f32.xlu0 %v1113_v10  ;;  %1185 = vadd.xlane.f32.xlu1 %v1114_v11  ;;  %v1607_v22 = vpack.c.bf16 %v2331_v16, %v2319_v6  ;;  %v2337_v24 = vpop.f32.mrb[23].mxu0  ;;  %v1687_v62 = vpack.c.bf16 %v2333_v17, %v2321_v8  ;;  %v2341_v26 = vpop.f32.mrb[23].mxu1  ;;  %v885_v10 = vmul.f32 %v2226_v15, %v2172_v44 }
 0x113   :  { %v1602_v4 = vpack.c.bf16 %v2337_v24, %v2327_v12  ;;  %v1682_v27 = vpack.c.bf16 %v2341_v26, %v2329_v13  ;;  %v886_v11 = vmul.f32 %v2237_v21, %v2172_v44 }
 0x114   :  { %1719 = vst [vmem:[#allocation2 + $0x58] sm:$0xff] %v1607_v22   ;;  %1735 = vst [vmem:[#allocation2 + $0xd8] sm:$0xff] %v1687_v62   ;;  %v1117_v22 = vmul.f32 %v2224_v14, %v2183_v53  ;;  %v1118_v62 = vmul.f32 %v2235_v20, %v2183_v53  ;;  %v883_v14 = vmul.f32 %v2172_v44, %v2233_v19 }
 0x115   :  { %1718 = vst [vmem:[#allocation2 + $0x50] sm:$0xff] %v1602_v4   ;;  %1734 = vst [vmem:[#allocation2 + $0xd0] sm:$0xff] %v1682_v27   ;;  %v1149_v4 = vmul.f32 %v2226_v15, %v2183_v53  ;;  %v1150_v27 = vmul.f32 %v2237_v21, %v2183_v53  ;;  %v884_v20 = vmul.f32 %v2172_v44, %v2245_v25 }
 0x116   :  { %1247 = vadd.xlane.f32.xlu0 %v1145_v28  ;;  %1249 = vadd.xlane.f32.xlu1 %v1146_v29  ;;  %v851_v28 = vmul.f32 %v2172_v44, %v2231_v18  ;;  %v852_v29 = vmul.f32 %v2172_v44, %v2241_v23  ;;  %v1115_v15 = vmul.f32 %v2183_v53, %v2231_v18 }
 0x117   :  { %v2363_v42 = vpop.f32.mrb[24].mxu0  ;;  %v2371_v49 = vpop.f32.mrb[24].mxu1  ;;  %v1116_v21 = vmul.f32 %v2183_v53, %v2241_v23 }
 0x118   :  { %v2369_v46 = vpop.f32.mrb[25].mxu0  ;;  %v2379_v56 = vpop.f32.mrb[25].mxu1 }
 0x119   :  { %v2373_v50 = vpop.f32.mrb[26].mxu0  ;;  %v2387_v60 = vpop.f32.mrb[26].mxu1 }
 0x11a   :  { %915 = vadd.xlane.f32.xlu0 %v847_v32  ;;  %917 = vadd.xlane.f32.xlu1 %v848_v33  ;;  %v1617_v2 = vpack.c.bf16 %v2373_v50, %v2363_v42  ;;  %v2377_v7 = vpop.f32.mrb[27].mxu0  ;;  %v1697_v61 = vpack.c.bf16 %v2387_v60, %v2371_v49  ;;  %v2391_v0 = vpop.f32.mrb[27].mxu1  ;;  %v1147_v33 = vmul.f32 %v2183_v53, %v2233_v19 }
 0x11b   :  { %v1612_v3 = vpack.c.bf16 %v2377_v7, %v2369_v46  ;;  %v1692_v1 = vpack.c.bf16 %v2391_v0, %v2379_v56  ;;  %v857_v19 = vmul.f32 %v2255_v30, %v2172_v44 }
 0x11c   :  { %1721 = vst [vmem:[#allocation2 + $0x68] sm:$0xff] %v1617_v2   ;;  %1737 = vst [vmem:[#allocation2 + $0xe8] sm:$0xff] %v1697_v61   ;;  %v889_v61 = vmul.f32 %v2257_v31, %v2172_v44 }
 0x11d   :  { %1720 = vst [vmem:[#allocation2 + $0x60] sm:$0xff] %v1612_v3   ;;  %1736 = vst [vmem:[#allocation2 + $0xe0] sm:$0xff] %v1692_v1   ;;  %v890_v1 = vmul.f32 %v2269_v37, %v2172_v44 }
 0x11e   :  { %979 = vadd.xlane.f32.xlu0 %v879_v63  ;;  %981 = vadd.xlane.f32.xlu1 %v880_v5  ;;  %v1148_v63 = vmul.f32 %v2183_v53, %v2245_v25  ;;  %v858_v25 = vmul.f32 %v2267_v36, %v2172_v44 }
 0x11f   :  { %v2419_v32 = vpop.f32.mrb[28].mxu0 }
 0x120   :  { %v2425_v5 = vpop.f32.mrb[29].mxu0 }
 0x122   :  { %1179 = vadd.xlane.f32.xlu0 %v1111_v38  ;;  %1181 = vadd.xlane.f32.xlu1 %v1112_v40  ;;  %v2427_v38 = vpop.f32.mrb[30].mxu0 }
 0x123   :  { %v1627_v18 = vpack.c.bf16 %v2427_v38, %v2419_v32  ;;  %v2431_v23 = vpop.f32.mrb[31].mxu0 }
 0x124   :  { %v1622_v40 = vpack.c.bf16 %v2431_v23, %v2425_v5 }
 0x125   :  { %1723 = vst [vmem:[#allocation2 + $0x78] sm:$0xff] %v1627_v18   ;;  %v891_v18 = vmul.f32 %v2172_v44, %v2297_v52 }
 0x126   :  { %1243 = vadd.xlane.f32.xlu0 %v1143_v43  ;;  %1245 = vadd.xlane.f32.xlu1 %v1144_v45  ;;  %v2435_v43 = vpop.f32.mrb[28].mxu1  ;;  %1722 = vst [vmem:[#allocation2 + $0x70] sm:$0xff] %v1622_v40   ;;  %v892_v40 = vmul.f32 %v2172_v44, %v2309_v59 }
 0x127   :  { %v2441_v45 = vpop.f32.mrb[29].mxu1 }
 0x128   :  { %v2443_v2 = vpop.f32.mrb[30].mxu1 }
 0x129   :  { %v1707_v3 = vpack.c.bf16 %v2443_v2, %v2435_v43 }
 0x12a   :  { %927 = vadd.xlane.f32.xlu0 %v853_v9  ;;  %929 = vadd.xlane.f32.xlu1 %v854_v58  ;;  %v2447_v9 = vpop.f32.mrb[31].mxu1 }
 0x12b   :  { %v1702_v58 = vpack.c.bf16 %v2447_v9, %v2441_v45  ;;  %1739 = vst [vmem:[#allocation2 + $0xf8] sm:$0xff] %v1707_v3   ;;  %v1123_v3 = vmul.f32 %v2183_v53, %v2295_v51 }
 0x12d   :  { %1738 = vst [vmem:[#allocation2 + $0xf0] sm:$0xff] %v1702_v58   ;;  %v1124_v58 = vmul.f32 %v2183_v53, %v2305_v57 }
 0x12e   :  { %991 = vadd.xlane.f32.xlu0 %v885_v10  ;;  %993 = vadd.xlane.f32.xlu1 %v886_v11  ;;  %v1121_v10 = vmul.f32 %v2255_v30, %v2183_v53  ;;  %v1122_v11 = vmul.f32 %v2267_v36, %v2183_v53  ;;  %v887_v30 = vmul.f32 %v2172_v44, %v2265_v35 }
 0x12f   :  { %v888_v36 = vmul.f32 %v2172_v44, %v2277_v41 }
 0x132   :  { %1191 = vadd.xlane.f32.xlu0 %v1117_v22  ;;  %1193 = vadd.xlane.f32.xlu1 %v1118_v62  ;;  %v1153_v22 = vmul.f32 %v2257_v31, %v2183_v53  ;;  %v1154_v62 = vmul.f32 %v2269_v37, %v2183_v53  ;;  %v1119_v31 = vmul.f32 %v2183_v53, %v2263_v34 }
 0x133   :  { %v1120_v37 = vmul.f32 %v2183_v53, %v2273_v39 }
 0x136   :  { %1255 = vadd.xlane.f32.xlu0 %v1149_v4  ;;  %1257 = vadd.xlane.f32.xlu1 %v1150_v27  ;;  %v855_v4 = vmul.f32 %v2172_v44, %v2263_v34  ;;  %v856_v27 = vmul.f32 %v2172_v44, %v2273_v39  ;;  %v893_v34 = vmul.f32 %v2289_v48, %v2172_v44 }
 0x137   :  { %v894_v39 = vmul.f32 %v2301_v55, %v2172_v44 }
 0x13a   :  { %923 = vadd.xlane.f32.xlu0 %v851_v28  ;;  %925 = vadd.xlane.f32.xlu1 %v852_v29  ;;  %v1151_v28 = vmul.f32 %v2183_v53, %v2265_v35  ;;  %v1152_v29 = vmul.f32 %v2183_v53, %v2277_v41  ;;  %v1125_v35 = vmul.f32 %v2287_v47, %v2183_v53 }
 0x13b   :  { %v1126_v41 = vmul.f32 %v2299_v54, %v2183_v53 }
 0x13e   :  { %987 = vadd.xlane.f32.xlu0 %v883_v14  ;;  %989 = vadd.xlane.f32.xlu1 %v884_v20  ;;  %v861_v14 = vmul.f32 %v2287_v47, %v2172_v44  ;;  %v862_v20 = vmul.f32 %v2299_v54, %v2172_v44  ;;  %v859_v47 = vmul.f32 %v2172_v44, %v2295_v51 }
 0x13f   :  { %v1155_v51 = vmul.f32 %v2183_v53, %v2297_v52  ;;  %v865_v52 = vmul.f32 %v2319_v6, %v2172_v44 }
 0x142   :  { %1187 = vadd.xlane.f32.xlu0 %v1115_v15  ;;  %1189 = vadd.xlane.f32.xlu1 %v1116_v21  ;;  %v1157_v15 = vmul.f32 %v2289_v48, %v2183_v53  ;;  %v1158_v21 = vmul.f32 %v2301_v55, %v2183_v53  ;;  %v860_v48 = vmul.f32 %v2172_v44, %v2305_v57 }
 0x143   :  { %v1156_v57 = vmul.f32 %v2183_v53, %v2309_v59  ;;  %v866_v59 = vmul.f32 %v2331_v16, %v2172_v44 }
 0x146   :  { %1251 = vadd.xlane.f32.xlu0 %v1147_v33  ;;  %1253 = vadd.xlane.f32.xlu1 %v1148_v63 }
 0x14a   :  { %935 = vadd.xlane.f32.xlu0 %v857_v19  ;;  %937 = vadd.xlane.f32.xlu1 %v858_v25 }
 0x14e   :  { %999 = vadd.xlane.f32.xlu0 %v889_v61  ;;  %1001 = vadd.xlane.f32.xlu1 %v890_v1 }
 0x152   :  { %1199 = vadd.xlane.f32.xlu0 %v1121_v10  ;;  %1201 = vadd.xlane.f32.xlu1 %v1122_v11 }
 0x156   :  { %1263 = vadd.xlane.f32.xlu0 %v1153_v22  ;;  %1265 = vadd.xlane.f32.xlu1 %v1154_v62 }
 0x15a   :  { %931 = vadd.xlane.f32.xlu0 %v855_v4  ;;  %933 = vadd.xlane.f32.xlu1 %v856_v27  ;;  %v897_v4 = vmul.f32 %v2321_v8, %v2172_v44  ;;  %v898_v27 = vmul.f32 %v2333_v17, %v2172_v44 }
 0x15e   :  { %995 = vadd.xlane.f32.xlu0 %v887_v30  ;;  %997 = vadd.xlane.f32.xlu1 %v888_v36 }
 0x162   :  { %1195 = vadd.xlane.f32.xlu0 %v1119_v31  ;;  %1197 = vadd.xlane.f32.xlu1 %v1120_v37  ;;  %v1129_v31 = vmul.f32 %v2319_v6, %v2183_v53  ;;  %v1130_v37 = vmul.f32 %v2331_v16, %v2183_v53  ;;  %v1161_v6 = vmul.f32 %v2321_v8, %v2183_v53 }
 0x163   :  { %v1162_v16 = vmul.f32 %v2333_v17, %v2183_v53  ;;  %v863_v8 = vmul.f32 %v2172_v44, %v2327_v12  ;;  %v864_v17 = vmul.f32 %v2172_v44, %v2337_v24 }
 0x166   :  { %1259 = vadd.xlane.f32.xlu0 %v1151_v28  ;;  %1261 = vadd.xlane.f32.xlu1 %v1152_v29 }
 0x16a   :  { %943 = vadd.xlane.f32.xlu0 %v861_v14  ;;  %945 = vadd.xlane.f32.xlu1 %v862_v20 }
 0x16e   :  { %1007 = vadd.xlane.f32.xlu0 %v893_v34  ;;  %1009 = vadd.xlane.f32.xlu1 %v894_v39 }
 0x172   :  { %1207 = vadd.xlane.f32.xlu0 %v1125_v35  ;;  %1209 = vadd.xlane.f32.xlu1 %v1126_v41  ;;  %v895_v35 = vmul.f32 %v2172_v44, %v2329_v13  ;;  %v896_v41 = vmul.f32 %v2172_v44, %v2341_v26 }
 0x176   :  { %1271 = vadd.xlane.f32.xlu0 %v1157_v15  ;;  %1273 = vadd.xlane.f32.xlu1 %v1158_v21 }
 0x177   :  { %v976_v33 = vpop.xlane.xlu0 %975  ;;  %v912_v63 = vpop.xlane.xlu1 %911 }
 0x178   :  { %1070 = vst.msk [vmem:[%s3136_s5 + $0x110] sm:$0xff] %vm1035_vm1, %v976_v33  ;;  %1038 = vst.msk [vmem:[%s3136_s5 + $0x10] sm:$0xff] %vm1035_vm1, %v912_v63  ;;  %v1127_v33 = vmul.f32 %v2183_v53, %v2327_v12  ;;  %v1128_v63 = vmul.f32 %v2183_v53, %v2337_v24  ;;  %v1159_v12 = vmul.f32 %v2183_v53, %v2329_v13 }
 0x179   :  { %v1160_v24 = vmul.f32 %v2183_v53, %v2341_v26  ;;  %v869_v13 = vmul.f32 %v2363_v42, %v2172_v44  ;;  %v870_v26 = vmul.f32 %v2373_v50, %v2172_v44 }
 0x17a   :  { %939 = vadd.xlane.f32.xlu0 %v859_v47  ;;  %941 = vadd.xlane.f32.xlu1 %v860_v48 }
 0x17b   :  { %v1176_v54 = vpop.xlane.xlu0 %1175  ;;  %v914_v55 = vpop.xlane.xlu1 %913 }
 0x17c   :  { %1301 = vst.msk [vmem:[%s3137_s6 + $0x10] sm:$0xff] %vm1035_vm1, %v1176_v54  ;;  %1039 = vst.msk [vmem:[%s3136_s5 + $0x18] sm:$0xff] %vm1035_vm1, %v914_v55 }
 0x17e   :  { %1003 = vadd.xlane.f32.xlu0 %v891_v18  ;;  %1005 = vadd.xlane.f32.xlu1 %v892_v40 }
 0x17f   :  { %v1240_v19 = vpop.xlane.xlu0 %1239  ;;  %v978_v25 = vpop.xlane.xlu1 %977 }
 0x180   :  { %1333 = vst.msk [vmem:[%s3137_s6 + $0x110] sm:$0xff] %vm1035_vm1, %v1240_v19  ;;  %1071 = vst.msk [vmem:[%s3136_s5 + $0x118] sm:$0xff] %vm1035_vm1, %v978_v25  ;;  %v901_v19 = vmul.f32 %v2371_v49, %v2172_v44  ;;  %v902_v25 = vmul.f32 %v2387_v60, %v2172_v44 }
 0x182   :  { %1203 = vadd.xlane.f32.xlu0 %v1123_v3  ;;  %1205 = vadd.xlane.f32.xlu1 %v1124_v58 }
 0x183   :  { %v908_v61 = vpop.xlane.xlu0 %907  ;;  %v1178_v1 = vpop.xlane.xlu1 %1177 }
 0x184   :  { %1036 = vst.msk [vmem:[%s3136_s5] sm:$0xff] %vm1035_vm1, %v908_v61  ;;  %1302 = vst.msk [vmem:[%s3137_s6 + $0x18] sm:$0xff] %vm1035_vm1, %v1178_v1  ;;  %v1133_v61 = vmul.f32 %v2363_v42, %v2183_v53  ;;  %v1134_v1 = vmul.f32 %v2373_v50, %v2183_v53  ;;  %v1165_v42 = vmul.f32 %v2371_v49, %v2183_v53 }
 0x185   :  { %v1166_v50 = vmul.f32 %v2387_v60, %v2183_v53  ;;  %v867_v49 = vmul.f32 %v2172_v44, %v2369_v46  ;;  %v868_v60 = vmul.f32 %v2172_v44, %v2377_v7 }
 0x186   :  { %1267 = vadd.xlane.f32.xlu0 %v1155_v51  ;;  %1269 = vadd.xlane.f32.xlu1 %v1156_v57 }
 0x187   :  { %v972_v10 = vpop.xlane.xlu0 %971  ;;  %v1242_v11 = vpop.xlane.xlu1 %1241 }
 0x188   :  { %1068 = vst.msk [vmem:[%s3136_s5 + $0x100] sm:$0xff] %vm1035_vm1, %v972_v10  ;;  %1334 = vst.msk [vmem:[%s3137_s6 + $0x118] sm:$0xff] %vm1035_vm1, %v1242_v11 }
 0x18a   :  { %951 = vadd.xlane.f32.xlu0 %v865_v52  ;;  %953 = vadd.xlane.f32.xlu1 %v866_v59 }
 0x18b   :  { %v1172_v22 = vpop.xlane.xlu0 %1171  ;;  %v974_v62 = vpop.xlane.xlu1 %973 }
 0x18c   :  { %1299 = vst.msk [vmem:[%s3137_s6] sm:$0xff] %vm1035_vm1, %v1172_v22  ;;  %1069 = vst.msk [vmem:[%s3136_s5 + $0x108] sm:$0xff] %vm1035_vm1, %v974_v62  ;;  %v899_v22 = vmul.f32 %v2172_v44, %v2379_v56  ;;  %v900_v62 = vmul.f32 %v2172_v44, %v2391_v0 }
 0x18e   :  { %1015 = vadd.xlane.f32.xlu0 %v897_v4  ;;  %1017 = vadd.xlane.f32.xlu1 %v898_v27 }
 0x18f   :  { %v1236_v30 = vpop.xlane.xlu0 %1235  ;;  %v1174_v36 = vpop.xlane.xlu1 %1173 }
 0x190   :  { %1331 = vst.msk [vmem:[%s3137_s6 + $0x100] sm:$0xff] %vm1035_vm1, %v1236_v30  ;;  %1300 = vst.msk [vmem:[%s3137_s6 + $0x8] sm:$0xff] %vm1035_vm1, %v1174_v36  ;;  %v1131_v30 = vmul.f32 %v2183_v53, %v2369_v46  ;;  %v1132_v36 = vmul.f32 %v2183_v53, %v2377_v7  ;;  %v1163_v46 = vmul.f32 %v2183_v53, %v2379_v56 }
 0x191   :  { %v1164_v7 = vmul.f32 %v2183_v53, %v2391_v0  ;;  %v873_v56 = vmul.f32 %v2419_v32, %v2172_v44  ;;  %v874_v0 = vmul.f32 %v2427_v38, %v2172_v44 }
 0x192   :  { %1215 = vadd.xlane.f32.xlu0 %v1129_v31  ;;  %1217 = vadd.xlane.f32.xlu1 %v1130_v37 }
 0x193   :  { %v1238_v28 = vpop.xlane.xlu1 %1237  ;;  %v910_v29 = vpop.xlane.xlu0 %909 }
 0x194   :  { %1332 = vst.msk [vmem:[%s3137_s6 + $0x108] sm:$0xff] %vm1035_vm1, %v1238_v28  ;;  %1037 = vst.msk [vmem:[%s3136_s5 + $0x8] sm:$0xff] %vm1035_vm1, %v910_v29 }
 0x196   :  { %1279 = vadd.xlane.f32.xlu0 %v1161_v6  ;;  %1281 = vadd.xlane.f32.xlu1 %v1162_v16 }
 0x197   :  { %v920_v14 = vpop.xlane.xlu0 %919  ;;  %v922_v20 = vpop.xlane.xlu1 %921 }
 0x198   :  { %1042 = vst.msk [vmem:[%s3136_s5 + $0x30] sm:$0xff] %vm1035_vm1, %v920_v14  ;;  %1043 = vst.msk [vmem:[%s3136_s5 + $0x38] sm:$0xff] %vm1035_vm1, %v922_v20  ;;  %v905_v14 = vmul.f32 %v2435_v43, %v2172_v44  ;;  %v906_v20 = vmul.f32 %v2443_v2, %v2172_v44 }
 0x19a   :  { %947 = vadd.xlane.f32.xlu0 %v863_v8  ;;  %949 = vadd.xlane.f32.xlu1 %v864_v17 }
 0x19b   :  { %v984_v34 = vpop.xlane.xlu0 %983  ;;  %v986_v39 = vpop.xlane.xlu1 %985 }
 0x19c   :  { %1074 = vst.msk [vmem:[%s3136_s5 + $0x130] sm:$0xff] %vm1035_vm1, %v984_v34  ;;  %1075 = vst.msk [vmem:[%s3136_s5 + $0x138] sm:$0xff] %vm1035_vm1, %v986_v39  ;;  %v1137_v34 = vmul.f32 %v2419_v32, %v2183_v53  ;;  %v1138_v39 = vmul.f32 %v2427_v38, %v2183_v53  ;;  %v871_v32 = vmul.f32 %v2172_v44, %v2425_v5 }
 0x19d   :  { %v872_v38 = vmul.f32 %v2172_v44, %v2431_v23 }
 0x19e   :  { %1011 = vadd.xlane.f32.xlu0 %v895_v35  ;;  %1013 = vadd.xlane.f32.xlu1 %v896_v41 }
 0x19f   :  { %v1184_v15 = vpop.xlane.xlu0 %1183  ;;  %v1186_v21 = vpop.xlane.xlu1 %1185 }
 0x1a0   :  { %1305 = vst.msk [vmem:[%s3137_s6 + $0x30] sm:$0xff] %vm1035_vm1, %v1184_v15  ;;  %1306 = vst.msk [vmem:[%s3137_s6 + $0x38] sm:$0xff] %vm1035_vm1, %v1186_v21 }
 0x1a2   :  { %1211 = vadd.xlane.f32.xlu0 %v1127_v33  ;;  %1213 = vadd.xlane.f32.xlu1 %v1128_v63  ;;  %v903_v33 = vmul.f32 %v2172_v44, %v2441_v45  ;;  %v904_v63 = vmul.f32 %v2172_v44, %v2447_v9  ;;  %v1136_v44 = vmul.f32 %v2183_v53, %v2431_v23 }
 0x1a3   :  { %v1248_v47 = vpop.xlane.xlu0 %1247  ;;  %v1250_v48 = vpop.xlane.xlu1 %1249  ;;  %v1168_v23 = vmul.f32 %v2183_v53, %v2447_v9  ;;  %v1170_v9 = vmul.f32 %v2443_v2, %v2183_v53 }
 0x1a4   :  { %1337 = vst.msk [vmem:[%s3137_s6 + $0x130] sm:$0xff] %vm1035_vm1, %v1248_v47  ;;  %1338 = vst.msk [vmem:[%s3137_s6 + $0x138] sm:$0xff] %vm1035_vm1, %v1250_v48 }
 0x1a6   :  { %1275 = vadd.xlane.f32.xlu0 %v1159_v12  ;;  %1277 = vadd.xlane.f32.xlu1 %v1160_v24  ;;  %v1135_v12 = vmul.f32 %v2183_v53, %v2425_v5  ;;  %v1167_v5 = vmul.f32 %v2183_v53, %v2441_v45  ;;  %v1169_v45 = vmul.f32 %v2435_v43, %v2183_v53 }
 0x1a7   :  { %v916_v54 = vpop.xlane.xlu0 %915  ;;  %v918_v55 = vpop.xlane.xlu1 %917 }
 0x1a8   :  { %1040 = vst.msk [vmem:[%s3136_s5 + $0x20] sm:$0xff] %vm1035_vm1, %v916_v54  ;;  %1041 = vst.msk [vmem:[%s3136_s5 + $0x28] sm:$0xff] %vm1035_vm1, %v918_v55 }
 0x1aa   :  { %959 = vadd.xlane.f32.xlu0 %v869_v13  ;;  %961 = vadd.xlane.f32.xlu1 %v870_v26 }
 0x1ab   :  { %v980_v18 = vpop.xlane.xlu0 %979  ;;  %v982_v40 = vpop.xlane.xlu1 %981 }
 0x1ac   :  { %1072 = vst.msk [vmem:[%s3136_s5 + $0x120] sm:$0xff] %vm1035_vm1, %v980_v18  ;;  %1073 = vst.msk [vmem:[%s3136_s5 + $0x128] sm:$0xff] %vm1035_vm1, %v982_v40 }
 0x1ae   :  { %1023 = vadd.xlane.f32.xlu0 %v901_v19  ;;  %1025 = vadd.xlane.f32.xlu1 %v902_v25 }
 0x1af   :  { %v1180_v3 = vpop.xlane.xlu0 %1179  ;;  %v1182_v58 = vpop.xlane.xlu1 %1181 }
 0x1b0   :  { %1303 = vst.msk [vmem:[%s3137_s6 + $0x20] sm:$0xff] %vm1035_vm1, %v1180_v3  ;;  %1304 = vst.msk [vmem:[%s3137_s6 + $0x28] sm:$0xff] %vm1035_vm1, %v1182_v58 }
 0x1b2   :  { %1223 = vadd.xlane.f32.xlu0 %v1133_v61  ;;  %1225 = vadd.xlane.f32.xlu1 %v1134_v1 }
 0x1b3   :  { %v1244_v51 = vpop.xlane.xlu0 %1243  ;;  %v1246_v57 = vpop.xlane.xlu1 %1245 }
 0x1b4   :  { %1335 = vst.msk [vmem:[%s3137_s6 + $0x120] sm:$0xff] %vm1035_vm1, %v1244_v51  ;;  %1336 = vst.msk [vmem:[%s3137_s6 + $0x128] sm:$0xff] %vm1035_vm1, %v1246_v57 }
 0x1b6   :  { %1287 = vadd.xlane.f32.xlu0 %v1165_v42  ;;  %1289 = vadd.xlane.f32.xlu1 %v1166_v50 }
 0x1b7   :  { %v928_v10 = vpop.xlane.xlu0 %927  ;;  %v930_v11 = vpop.xlane.xlu1 %929 }
 0x1b8   :  { %1046 = vst.msk [vmem:[%s3136_s5 + $0x50] sm:$0xff] %vm1035_vm1, %v928_v10  ;;  %1047 = vst.msk [vmem:[%s3136_s5 + $0x58] sm:$0xff] %vm1035_vm1, %v930_v11 }
 0x1ba   :  { %955 = vadd.xlane.f32.xlu0 %v867_v49  ;;  %957 = vadd.xlane.f32.xlu1 %v868_v60 }
 0x1bb   :  { %v992_v52 = vpop.xlane.xlu0 %991  ;;  %v994_v59 = vpop.xlane.xlu1 %993 }
 0x1bc   :  { %1078 = vst.msk [vmem:[%s3136_s5 + $0x150] sm:$0xff] %vm1035_vm1, %v992_v52  ;;  %1079 = vst.msk [vmem:[%s3136_s5 + $0x158] sm:$0xff] %vm1035_vm1, %v994_v59 }
 0x1be   :  { %1019 = vadd.xlane.f32.xlu0 %v899_v22  ;;  %1021 = vadd.xlane.f32.xlu1 %v900_v62 }
 0x1bf   :  { %v1192_v4 = vpop.xlane.xlu0 %1191  ;;  %v1194_v27 = vpop.xlane.xlu1 %1193 }
 0x1c0   :  { %1309 = vst.msk [vmem:[%s3137_s6 + $0x50] sm:$0xff] %vm1035_vm1, %v1192_v4  ;;  %1310 = vst.msk [vmem:[%s3137_s6 + $0x58] sm:$0xff] %vm1035_vm1, %v1194_v27 }
 0x1c2   :  { %1219 = vadd.xlane.f32.xlu0 %v1131_v30  ;;  %1221 = vadd.xlane.f32.xlu1 %v1132_v36 }
 0x1c3   :  { %v1256_v31 = vpop.xlane.xlu0 %1255  ;;  %v1258_v37 = vpop.xlane.xlu1 %1257 }
 0x1c4   :  { %1341 = vst.msk [vmem:[%s3137_s6 + $0x150] sm:$0xff] %vm1035_vm1, %v1256_v31  ;;  %1342 = vst.msk [vmem:[%s3137_s6 + $0x158] sm:$0xff] %vm1035_vm1, %v1258_v37 }
 0x1c6   :  { %1283 = vadd.xlane.f32.xlu0 %v1163_v46  ;;  %1285 = vadd.xlane.f32.xlu1 %v1164_v7 }
 0x1c7   :  { %v924_v28 = vpop.xlane.xlu0 %923  ;;  %v926_v29 = vpop.xlane.xlu1 %925 }
 0x1c8   :  { %1044 = vst.msk [vmem:[%s3136_s5 + $0x40] sm:$0xff] %vm1035_vm1, %v924_v28  ;;  %1045 = vst.msk [vmem:[%s3136_s5 + $0x48] sm:$0xff] %vm1035_vm1, %v926_v29 }
 0x1ca   :  { %967 = vadd.xlane.f32.xlu0 %v873_v56  ;;  %969 = vadd.xlane.f32.xlu1 %v874_v0 }
 0x1cb   :  { %v988_v6 = vpop.xlane.xlu0 %987  ;;  %v990_v16 = vpop.xlane.xlu1 %989 }
 0x1cc   :  { %1076 = vst.msk [vmem:[%s3136_s5 + $0x140] sm:$0xff] %vm1035_vm1, %v988_v6  ;;  %1077 = vst.msk [vmem:[%s3136_s5 + $0x148] sm:$0xff] %vm1035_vm1, %v990_v16 }
 0x1ce   :  { %1031 = vadd.xlane.f32.xlu0 %v905_v14  ;;  %1033 = vadd.xlane.f32.xlu1 %v906_v20 }
 0x1cf   :  { %v1188_v8 = vpop.xlane.xlu0 %1187  ;;  %v1190_v17 = vpop.xlane.xlu1 %1189 }
 0x1d0   :  { %1307 = vst.msk [vmem:[%s3137_s6 + $0x40] sm:$0xff] %vm1035_vm1, %v1188_v8  ;;  %1308 = vst.msk [vmem:[%s3137_s6 + $0x48] sm:$0xff] %vm1035_vm1, %v1190_v17 }
 0x1d2   :  { %1231 = vadd.xlane.f32.xlu0 %v1137_v34  ;;  %1233 = vadd.xlane.f32.xlu1 %v1138_v39 }
 0x1d3   :  { %v1252_v35 = vpop.xlane.xlu0 %1251  ;;  %v1254_v41 = vpop.xlane.xlu1 %1253 }
 0x1d4   :  { %1339 = vst.msk [vmem:[%s3137_s6 + $0x140] sm:$0xff] %vm1035_vm1, %v1252_v35  ;;  %1340 = vst.msk [vmem:[%s3137_s6 + $0x148] sm:$0xff] %vm1035_vm1, %v1254_v41 }
 0x1d6   :  { %963 = vadd.xlane.f32.xlu0 %v871_v32  ;;  %965 = vadd.xlane.f32.xlu1 %v872_v38 }
 0x1d7   :  { %v936_v15 = vpop.xlane.xlu0 %935  ;;  %v938_v21 = vpop.xlane.xlu1 %937 }
 0x1d8   :  { %1050 = vst.msk [vmem:[%s3136_s5 + $0x70] sm:$0xff] %vm1035_vm1, %v936_v15  ;;  %1051 = vst.msk [vmem:[%s3136_s5 + $0x78] sm:$0xff] %vm1035_vm1, %v938_v21 }
 0x1da   :  { %1027 = vadd.xlane.f32.xlu0 %v903_v33  ;;  %1029 = vadd.xlane.f32.xlu1 %v904_v63 }
 0x1db   :  { %v1000_v47 = vpop.xlane.xlu0 %999  ;;  %v1002_v48 = vpop.xlane.xlu1 %1001 }
 0x1dc   :  { %1082 = vst.msk [vmem:[%s3136_s5 + $0x170] sm:$0xff] %vm1035_vm1, %v1000_v47  ;;  %1083 = vst.msk [vmem:[%s3136_s5 + $0x178] sm:$0xff] %vm1035_vm1, %v1002_v48 }
 0x1de   :  { %1227 = vadd.xlane.f32.xlu0 %v1135_v12  ;;  %1229 = vadd.xlane.f32.xlu1 %v1136_v44 }
 0x1df   :  { %v1200_v24 = vpop.xlane.xlu0 %1199  ;;  %v1202_v54 = vpop.xlane.xlu1 %1201 }
 0x1e0   :  { %1313 = vst.msk [vmem:[%s3137_s6 + $0x70] sm:$0xff] %vm1035_vm1, %v1200_v24  ;;  %1314 = vst.msk [vmem:[%s3137_s6 + $0x78] sm:$0xff] %vm1035_vm1, %v1202_v54 }
 0x1e2   :  { %1291 = vadd.xlane.f32.xlu0 %v1167_v5  ;;  %1293 = vadd.xlane.f32.xlu1 %v1168_v23 }
 0x1e3   :  { %v1264_v55 = vpop.xlane.xlu0 %1263  ;;  %v1266_v13 = vpop.xlane.xlu1 %1265 }
 0x1e4   :  { %1345 = vst.msk [vmem:[%s3137_s6 + $0x170] sm:$0xff] %vm1035_vm1, %v1264_v55  ;;  %1346 = vst.msk [vmem:[%s3137_s6 + $0x178] sm:$0xff] %vm1035_vm1, %v1266_v13 }
 0x1e6   :  { %1295 = vadd.xlane.f32.xlu0 %v1169_v45  ;;  %1297 = vadd.xlane.f32.xlu1 %v1170_v9 }
 0x1e7   :  { %v932_v26 = vpop.xlane.xlu0 %931  ;;  %v934_v18 = vpop.xlane.xlu1 %933 }
 0x1e8   :  { %1048 = vst.msk [vmem:[%s3136_s5 + $0x60] sm:$0xff] %vm1035_vm1, %v932_v26  ;;  %1049 = vst.msk [vmem:[%s3136_s5 + $0x68] sm:$0xff] %vm1035_vm1, %v934_v18 }
 0x1eb   :  { %v996_v53 = vpop.xlane.xlu0 %995  ;;  %v998_v43 = vpop.xlane.xlu1 %997 }
 0x1ec   :  { %1080 = vst.msk [vmem:[%s3136_s5 + $0x160] sm:$0xff] %vm1035_vm1, %v996_v53  ;;  %1081 = vst.msk [vmem:[%s3136_s5 + $0x168] sm:$0xff] %vm1035_vm1, %v998_v43 }
 0x1ef   :  { %v1196_v2 = vpop.xlane.xlu0 %1195  ;;  %v1198_v40 = vpop.xlane.xlu1 %1197 }
 0x1f0   :  { %1311 = vst.msk [vmem:[%s3137_s6 + $0x60] sm:$0xff] %vm1035_vm1, %v1196_v2  ;;  %1312 = vst.msk [vmem:[%s3137_s6 + $0x68] sm:$0xff] %vm1035_vm1, %v1198_v40 }
 0x1f3   :  { %v1260_v19 = vpop.xlane.xlu0 %1259  ;;  %v1262_v25 = vpop.xlane.xlu1 %1261 }
 0x1f4   :  { %1343 = vst.msk [vmem:[%s3137_s6 + $0x160] sm:$0xff] %vm1035_vm1, %v1260_v19  ;;  %1344 = vst.msk [vmem:[%s3137_s6 + $0x168] sm:$0xff] %vm1035_vm1, %v1262_v25 }
 0x1f5   :  { %1870 = shalt.err (!%p1867_p4)
}
 0x1f6   :  { %s1871_s13 = scalar_lea.hbm %s3135_s4, 4096 }
 0x1f7   :  { %p1872_p5 = scmp.ne.s32.totalorder %s3135_s4, %s1871_s13  ;;  %p1875_p6 = scmp.lt.u32.totalorder %s1871_s13, %s3135_s4 }
 0x1f9   :  { %p1877_p7 = pnand %p1875_p6, %p1872_p5 }
 0x1fb   :  { %1880 = shalt.err (!%p1877_p7)
}
 0x1fc   :  { %s1884_s0 = smov 64   ;;  %s1885_s18 = smov 4   ;;  %v944_v3 = vpop.xlane.xlu0 %943  ;;  %v946_v58 = vpop.xlane.xlu1 %945 }
 0x1fd   :  { %1374 = dma.vmem_to_hbm [thread:$0]  %s1369_s9, 4096, %s3135_s4, [#allocation3], %s1884_s0, %s1884_s0, %s1885_s18  }
 0x1fe   :  { %1054 = vst.msk [vmem:[%s3136_s5 + $0x90] sm:$0xff] %vm1035_vm1, %v944_v3  ;;  %1055 = vst.msk [vmem:[%s3136_s5 + $0x98] sm:$0xff] %vm1035_vm1, %v946_v58 }
 0x200   :  { %v1008_v61 = vpop.xlane.xlu0 %1007  ;;  %v1010_v1 = vpop.xlane.xlu1 %1009 }
 0x201   :  { %1086 = vst.msk [vmem:[%s3136_s5 + $0x190] sm:$0xff] %vm1035_vm1, %v1008_v61  ;;  %1087 = vst.msk [vmem:[%s3136_s5 + $0x198] sm:$0xff] %vm1035_vm1, %v1010_v1 }
 0x204   :  { %v1208_v51 = vpop.xlane.xlu0 %1207  ;;  %v1210_v57 = vpop.xlane.xlu1 %1209 }
 0x205   :  { %1317 = vst.msk [vmem:[%s3137_s6 + $0x90] sm:$0xff] %vm1035_vm1, %v1208_v51  ;;  %1318 = vst.msk [vmem:[%s3137_s6 + $0x98] sm:$0xff] %vm1035_vm1, %v1210_v57 }
 0x208   :  { %v1272_v42 = vpop.xlane.xlu0 %1271  ;;  %v1274_v50 = vpop.xlane.xlu1 %1273 }
 0x209   :  { %1349 = vst.msk [vmem:[%s3137_s6 + $0x190] sm:$0xff] %vm1035_vm1, %v1272_v42  ;;  %1350 = vst.msk [vmem:[%s3137_s6 + $0x198] sm:$0xff] %vm1035_vm1, %v1274_v50 }
 0x20c   :  { %v940_v10 = vpop.xlane.xlu0 %939  ;;  %v942_v11 = vpop.xlane.xlu1 %941 }
 0x20d   :  { %1052 = vst.msk [vmem:[%s3136_s5 + $0x80] sm:$0xff] %vm1035_vm1, %v940_v10  ;;  %1053 = vst.msk [vmem:[%s3136_s5 + $0x88] sm:$0xff] %vm1035_vm1, %v942_v11 }
 0x210   :  { %v1004_v49 = vpop.xlane.xlu0 %1003  ;;  %v1006_v60 = vpop.xlane.xlu1 %1005 }
 0x211   :  { %1084 = vst.msk [vmem:[%s3136_s5 + $0x180] sm:$0xff] %vm1035_vm1, %v1004_v49  ;;  %1085 = vst.msk [vmem:[%s3136_s5 + $0x188] sm:$0xff] %vm1035_vm1, %v1006_v60 }
 0x214   :  { %v1204_v52 = vpop.xlane.xlu0 %1203  ;;  %v1206_v59 = vpop.xlane.xlu1 %1205 }
 0x215   :  { %1315 = vst.msk [vmem:[%s3137_s6 + $0x80] sm:$0xff] %vm1035_vm1, %v1204_v52  ;;  %1316 = vst.msk [vmem:[%s3137_s6 + $0x88] sm:$0xff] %vm1035_vm1, %v1206_v59 }
 0x218   :  { %v1268_v22 = vpop.xlane.xlu0 %1267  ;;  %v1270_v62 = vpop.xlane.xlu1 %1269 }
 0x219   :  { %1347 = vst.msk [vmem:[%s3137_s6 + $0x180] sm:$0xff] %vm1035_vm1, %v1268_v22  ;;  %1348 = vst.msk [vmem:[%s3137_s6 + $0x188] sm:$0xff] %vm1035_vm1, %v1270_v62 }
 0x21c   :  { %v952_v4 = vpop.xlane.xlu0 %951  ;;  %v954_v27 = vpop.xlane.xlu1 %953 }
 0x21d   :  { %1058 = vst.msk [vmem:[%s3136_s5 + $0xb0] sm:$0xff] %vm1035_vm1, %v952_v4  ;;  %1059 = vst.msk [vmem:[%s3136_s5 + $0xb8] sm:$0xff] %vm1035_vm1, %v954_v27 }
 0x220   :  { %v1016_v30 = vpop.xlane.xlu0 %1015  ;;  %v1018_v36 = vpop.xlane.xlu1 %1017 }
 0x221   :  { %1090 = vst.msk [vmem:[%s3136_s5 + $0x1b0] sm:$0xff] %vm1035_vm1, %v1016_v30  ;;  %1091 = vst.msk [vmem:[%s3136_s5 + $0x1b8] sm:$0xff] %vm1035_vm1, %v1018_v36 }
 0x224   :  { %v1216_v31 = vpop.xlane.xlu0 %1215  ;;  %v1218_v37 = vpop.xlane.xlu1 %1217 }
 0x225   :  { %1321 = vst.msk [vmem:[%s3137_s6 + $0xb0] sm:$0xff] %vm1035_vm1, %v1216_v31  ;;  %1322 = vst.msk [vmem:[%s3137_s6 + $0xb8] sm:$0xff] %vm1035_vm1, %v1218_v37 }
 0x228   :  { %v1280_v46 = vpop.xlane.xlu0 %1279  ;;  %v1282_v7 = vpop.xlane.xlu1 %1281 }
 0x229   :  { %1353 = vst.msk [vmem:[%s3137_s6 + $0x1b0] sm:$0xff] %vm1035_vm1, %v1280_v46  ;;  %1354 = vst.msk [vmem:[%s3137_s6 + $0x1b8] sm:$0xff] %vm1035_vm1, %v1282_v7 }
 0x22c   :  { %v948_v28 = vpop.xlane.xlu0 %947  ;;  %v950_v29 = vpop.xlane.xlu1 %949 }
 0x22d   :  { %1056 = vst.msk [vmem:[%s3136_s5 + $0xa0] sm:$0xff] %vm1035_vm1, %v948_v28  ;;  %1057 = vst.msk [vmem:[%s3136_s5 + $0xa8] sm:$0xff] %vm1035_vm1, %v950_v29 }
 0x230   :  { %v1012_v56 = vpop.xlane.xlu0 %1011  ;;  %v1014_v0 = vpop.xlane.xlu1 %1013 }
 0x231   :  { %1088 = vst.msk [vmem:[%s3136_s5 + $0x1a0] sm:$0xff] %vm1035_vm1, %v1012_v56  ;;  %1089 = vst.msk [vmem:[%s3136_s5 + $0x1a8] sm:$0xff] %vm1035_vm1, %v1014_v0 }
 0x234   :  { %v1212_v6 = vpop.xlane.xlu0 %1211  ;;  %v1214_v16 = vpop.xlane.xlu1 %1213 }
 0x235   :  { %1319 = vst.msk [vmem:[%s3137_s6 + $0xa0] sm:$0xff] %vm1035_vm1, %v1212_v6  ;;  %1320 = vst.msk [vmem:[%s3137_s6 + $0xa8] sm:$0xff] %vm1035_vm1, %v1214_v16 }
 0x238   :  { %v1276_v14 = vpop.xlane.xlu0 %1275  ;;  %v1278_v20 = vpop.xlane.xlu1 %1277 }
 0x239   :  { %1351 = vst.msk [vmem:[%s3137_s6 + $0x1a0] sm:$0xff] %vm1035_vm1, %v1276_v14  ;;  %1352 = vst.msk [vmem:[%s3137_s6 + $0x1a8] sm:$0xff] %vm1035_vm1, %v1278_v20 }
 0x23c   :  { %v960_v8 = vpop.xlane.xlu0 %959  ;;  %v962_v17 = vpop.xlane.xlu1 %961 }
 0x23d   :  { %1062 = vst.msk [vmem:[%s3136_s5 + $0xd0] sm:$0xff] %vm1035_vm1, %v960_v8  ;;  %1063 = vst.msk [vmem:[%s3136_s5 + $0xd8] sm:$0xff] %vm1035_vm1, %v962_v17 }
 0x240   :  { %v1024_v34 = vpop.xlane.xlu0 %1023  ;;  %v1026_v39 = vpop.xlane.xlu1 %1025 }
 0x241   :  { %1094 = vst.msk [vmem:[%s3136_s5 + $0x1d0] sm:$0xff] %vm1035_vm1, %v1024_v34  ;;  %1095 = vst.msk [vmem:[%s3136_s5 + $0x1d8] sm:$0xff] %vm1035_vm1, %v1026_v39 }
 0x244   :  { %v1224_v35 = vpop.xlane.xlu0 %1223  ;;  %v1226_v41 = vpop.xlane.xlu1 %1225 }
 0x245   :  { %1325 = vst.msk [vmem:[%s3137_s6 + $0xd0] sm:$0xff] %vm1035_vm1, %v1224_v35  ;;  %1326 = vst.msk [vmem:[%s3137_s6 + $0xd8] sm:$0xff] %vm1035_vm1, %v1226_v41 }
 0x248   :  { %v1288_v32 = vpop.xlane.xlu0 %1287  ;;  %v1290_v38 = vpop.xlane.xlu1 %1289 }
 0x249   :  { %1357 = vst.msk [vmem:[%s3137_s6 + $0x1d0] sm:$0xff] %vm1035_vm1, %v1288_v32  ;;  %1358 = vst.msk [vmem:[%s3137_s6 + $0x1d8] sm:$0xff] %vm1035_vm1, %v1290_v38 }
 0x24c   :  { %v956_v15 = vpop.xlane.xlu0 %955  ;;  %v958_v21 = vpop.xlane.xlu1 %957 }
 0x24d   :  { %1060 = vst.msk [vmem:[%s3136_s5 + $0xc0] sm:$0xff] %vm1035_vm1, %v956_v15  ;;  %1061 = vst.msk [vmem:[%s3136_s5 + $0xc8] sm:$0xff] %vm1035_vm1, %v958_v21 }
 0x250   :  { %v1020_v33 = vpop.xlane.xlu0 %1019  ;;  %v1022_v63 = vpop.xlane.xlu1 %1021 }
 0x251   :  { %1092 = vst.msk [vmem:[%s3136_s5 + $0x1c0] sm:$0xff] %vm1035_vm1, %v1020_v33  ;;  %1093 = vst.msk [vmem:[%s3136_s5 + $0x1c8] sm:$0xff] %vm1035_vm1, %v1022_v63 }
 0x254   :  { %v1220_v47 = vpop.xlane.xlu0 %1219  ;;  %v1222_v48 = vpop.xlane.xlu1 %1221 }
 0x255   :  { %1323 = vst.msk [vmem:[%s3137_s6 + $0xc0] sm:$0xff] %vm1035_vm1, %v1220_v47  ;;  %1324 = vst.msk [vmem:[%s3137_s6 + $0xc8] sm:$0xff] %vm1035_vm1, %v1222_v48 }
 0x258   :  { %v1284_v12 = vpop.xlane.xlu0 %1283  ;;  %v1286_v44 = vpop.xlane.xlu1 %1285 }
 0x259   :  { %1355 = vst.msk [vmem:[%s3137_s6 + $0x1c0] sm:$0xff] %vm1035_vm1, %v1284_v12  ;;  %1356 = vst.msk [vmem:[%s3137_s6 + $0x1c8] sm:$0xff] %vm1035_vm1, %v1286_v44 }
 0x25c   :  { %v968_v24 = vpop.xlane.xlu0 %967  ;;  %v970_v54 = vpop.xlane.xlu1 %969 }
 0x25d   :  { %1066 = vst.msk [vmem:[%s3136_s5 + $0xf0] sm:$0xff] %vm1035_vm1, %v968_v24  ;;  %1067 = vst.msk [vmem:[%s3136_s5 + $0xf8] sm:$0xff] %vm1035_vm1, %v970_v54 }
 0x260   :  { %v1032_v5 = vpop.xlane.xlu0 %1031  ;;  %v1034_v23 = vpop.xlane.xlu1 %1033 }
 0x261   :  { %1098 = vst.msk [vmem:[%s3136_s5 + $0x1f0] sm:$0xff] %vm1035_vm1, %v1032_v5  ;;  %1099 = vst.msk [vmem:[%s3136_s5 + $0x1f8] sm:$0xff] %vm1035_vm1, %v1034_v23 }
 0x264   :  { %v1232_v55 = vpop.xlane.xlu0 %1231  ;;  %v1234_v13 = vpop.xlane.xlu1 %1233 }
 0x265   :  { %1329 = vst.msk [vmem:[%s3137_s6 + $0xf0] sm:$0xff] %vm1035_vm1, %v1232_v55  ;;  %1330 = vst.msk [vmem:[%s3137_s6 + $0xf8] sm:$0xff] %vm1035_vm1, %v1234_v13 }
 0x268   :  { %v964_v45 = vpop.xlane.xlu0 %963  ;;  %v966_v9 = vpop.xlane.xlu1 %965 }
 0x269   :  { %1064 = vst.msk [vmem:[%s3136_s5 + $0xe0] sm:$0xff] %vm1035_vm1, %v964_v45  ;;  %1065 = vst.msk [vmem:[%s3136_s5 + $0xe8] sm:$0xff] %vm1035_vm1, %v966_v9 }
 0x26c   :  { %v1028_v26 = vpop.xlane.xlu0 %1027  ;;  %v1030_v18 = vpop.xlane.xlu1 %1029 }
 0x26d   :  { %1096 = vst.msk [vmem:[%s3136_s5 + $0x1e0] sm:$0xff] %vm1035_vm1, %v1028_v26  ;;  %1097 = vst.msk [vmem:[%s3136_s5 + $0x1e8] sm:$0xff] %vm1035_vm1, %v1030_v18 }
 0x270   :  { %v1228_v53 = vpop.xlane.xlu0 %1227  ;;  %v1230_v43 = vpop.xlane.xlu1 %1229 }
 0x271   :  { %1327 = vst.msk [vmem:[%s3137_s6 + $0xe0] sm:$0xff] %vm1035_vm1, %v1228_v53  ;;  %1328 = vst.msk [vmem:[%s3137_s6 + $0xe8] sm:$0xff] %vm1035_vm1, %v1230_v43 }
 0x274   :  { %v1292_v2 = vpop.xlane.xlu0 %1291  ;;  %v1294_v40 = vpop.xlane.xlu1 %1293 }
 0x275   :  { %1359 = vst.msk [vmem:[%s3137_s6 + $0x1e0] sm:$0xff] %vm1035_vm1, %v1292_v2  ;;  %1360 = vst.msk [vmem:[%s3137_s6 + $0x1e8] sm:$0xff] %vm1035_vm1, %v1294_v40 }
 0x278   :  { %v1296_v19 = vpop.xlane.xlu0 %1295  ;;  %v1298_v25 = vpop.xlane.xlu1 %1297 }
 0x279   :  { %1361 = vst.msk [vmem:[%s3137_s6 + $0x1f0] sm:$0xff] %vm1035_vm1, %v1296_v19  ;;  %1362 = vst.msk [vmem:[%s3137_s6 + $0x1f8] sm:$0xff] %vm1035_vm1, %v1298_v25 }
 0x27a   :  { %1881 = dma.done.wait [#allocation3], 4096  }
 0x27b   :  { %1882 = vsyncadd [#allocation3], 4294963200 }
 0x27c   :  { %1386 = vsyncpa [#allocation3], 1 }

</bundles_post_ra>
